<compile_context>
chip_gen: v7x
topology: tpu7x:2x2x1
jax: 0.10.0
libtpu: 0.0.40
codegen_flags: <defaults>
</compile_context>

<pallas_src>
import functools
import math

import jax
import jax.numpy as jnp
from jax.experimental import pallas as pl
from jax.experimental.pallas import tpu as pltpu

# ----------------------------- config ---------------------------------------
BATCH = 2
SEQ = 8
INPUT_SIZE = 32
HIDDEN = 64          # nn.GRU hidden_size
HIDDEN_PAD = 128     # per-gate lane width (gate slices at lane 0 / 128 / 256)
OUT_SIZE = 8
NUM_LAYERS = 1       # nn.GRU default

_VMEM = pl.BlockSpec(memory_space=pltpu.MemorySpace.VMEM)


def _round_up(n, m):
    return (n + m - 1) // m * m


# ----------------------------- fused kernel ---------------------------------
def gru_forward_kernel(x_ref, w_ref, o_ref, *, num_layers, seq_len, batch,
                       hidden_pad, out_size, layer_offs, fc_offs):
    HP = hidden_pad
    B = batch
    S = seq_len

    seq_in = x_ref[...]                              # (S*B, d_in) time-major f32
    h_last = None
    for l, (o_wih, k_rows, o_whh, o_bih, o_bhn) in enumerate(layer_offs):
        wih = w_ref[o_wih:o_wih + k_rows, :]         # (d_in, 3HP) pre-transposed
        whh = w_ref[o_whh:o_whh + HP, :]             # (HP, 3HP)  pre-transposed
        bih = w_ref[o_bih:o_bih + 1, :]              # (1, 3HP)   b_hr/b_hz folded in
        bhn = w_ref[o_bhn:o_bhn + 1, 2 * HP:3 * HP]  # (1, HP)

        # Input projection for every timestep: ONE 2-D MXU matmul, no transpose.
        xp = jnp.dot(seq_in, wih, preferred_element_type=jnp.float32) + bih
        # xp rows are time-major: rows [t*B, (t+1)*B) belong to step t.

        bhn_b = jnp.broadcast_to(bhn, (B, HP))       # hoisted out of the loop

        keep_seq = (l + 1) < num_layers
        hs = []
        h = jnp.zeros((B, HP), jnp.float32)
        for t in range(S):                           # static unroll, serial chain
            xp_t = xp[t * B:(t + 1) * B, :]          # contiguous leading-row slice
            hp = jnp.dot(h, whh, preferred_element_type=jnp.float32)  # (B, 3HP)
            # PyTorch GRU gate order r, z, n; slices are 128-lane aligned.
            r = jax.nn.sigmoid(xp_t[:, :HP] + hp[:, :HP])
            z = jax.nn.sigmoid(xp_t[:, HP:2 * HP] + hp[:, HP:2 * HP])
            n = jnp.tanh(xp_t[:, 2 * HP:] + r * (hp[:, 2 * HP:] + bhn_b))
            h = (1.0 - z) * n + z * h
            if keep_seq:
                hs.append(h)
        h_last = h
        if keep_seq:
            seq_in = jnp.concatenate(hs, axis=0)     # (S*B, HP) time-major

    # Final Linear on the last timestep's hidden state (== gru_out[:, -1, :]).
    o_wfc, o_bfc = fc_offs
    wfc = w_ref[o_wfc:o_wfc + HP, :out_size]         # (HP, O) pre-transposed
    bfc = w_ref[o_bfc:o_bfc + 1, :out_size]          # (1, O)
    o_ref[...] = jnp.dot(h_last, wfc, preferred_element_type=jnp.float32) + bfc


# ----------------------------- host-side parameter packing -------------------
def pack_params(params, *, input_size, hidden, hidden_pad, out_size):
    """Transpose to contraction-friendly layouts, pad each gate to 128 lanes,
    fold b_hr/b_hz into the input bias, and pack everything into ONE slab."""
    H, HP = hidden, hidden_pad
    W = 3 * HP

    def expand_gates(m):                             # (rows, 3H) -> (rows, 3HP)
        rows = m.shape[0]
        out = jnp.zeros((rows, W), jnp.float32)
        for g in range(3):
            out = out.at[:, g * HP:g * HP + H].set(m[:, g * H:(g + 1) * H])
        return out

    def pad_rows(m, rows):
        return jnp.zeros((rows, W), jnp.float32).at[:m.shape[0], :].set(m)

    sections, layer_offs = [], []
    cur = 0

    def add(section):
        nonlocal cur
        off = cur
        sections.append(section)
        cur += section.shape[0]
        return off

    for li, (wih, whh, bih, bhh) in enumerate(params['layers']):
        if li == 0:
            k_rows = input_size                      # true contraction dim
            sec_rows = _round_up(input_size, 8)
        else:
            k_rows = HP                              # padded hidden feeds layer l>0
            sec_rows = HP
        wih_s = pad_rows(expand_gates(wih.T), sec_rows)       # (sec_rows, 3HP)
        whh_s = pad_rows(expand_gates(whh.T), HP)             # (HP, 3HP)
        # Fold b_hr / b_hz into the input bias (exact); keep b_hn separate.
        b_comb = jnp.concatenate([bih[:2 * H] + bhh[:2 * H], bih[2 * H:]])
        bih_s = pad_rows(expand_gates(b_comb[None, :]), 8)
        bhn_s = pad_rows(
            jnp.zeros((1, W), jnp.float32).at[0, 2 * HP:2 * HP + H].set(bhh[2 * H:]),
            8)
        o_wih = add(wih_s)
        o_whh = add(whh_s)
        o_bih = add(bih_s)
        o_bhn = add(bhn_s)
        layer_offs.append((o_wih, k_rows, o_whh, o_bih, o_bhn))

    wfc_s = pad_rows(
        jnp.zeros((H, W), jnp.float32).at[:, :out_size].set(params['wfc'].T), HP)
    bfc_s = pad_rows(
        jnp.zeros((1, W), jnp.float32).at[0, :out_size].set(params['bfc']), 8)
    o_wfc = add(wfc_s)
    o_bfc = add(bfc_s)

    slab = jnp.concatenate(sections, axis=0)         # single VMEM-resident slab
    return slab, tuple(layer_offs), (o_wfc, o_bfc)


# ----------------------------- wrapper ---------------------------------------
def gru_model_forward(x, packed):
    """x: (batch, seq, input_size) -> (batch, output_size)"""
    slab, layer_offs, fc_offs = packed
    B, S, I = x.shape
    # Time-major flatten on the host so the kernel's per-step read is a
    # contiguous leading-row slice.
    x2d = jnp.transpose(x, (1, 0, 2)).reshape(S * B, I)

    kern = functools.partial(
        gru_forward_kernel, num_layers=len(layer_offs), seq_len=S, batch=B,
        hidden_pad=HIDDEN_PAD, out_size=OUT_SIZE,
        layer_offs=layer_offs, fc_offs=fc_offs)

    return pl.pallas_call(
        kern,
        out_shape=jax.ShapeDtypeStruct((B, OUT_SIZE), jnp.float32),
        in_specs=[_VMEM, _VMEM],
        out_specs=_VMEM,
    )(x2d, slab)


# ----------------------------- params (PyTorch layout) -----------------------
def init_params(key):
    bound = 1.0 / math.sqrt(HIDDEN)                  # PyTorch GRU/Linear init

    def unif(k, shape):
        return jax.random.uniform(k, shape, jnp.float32, -bound, bound)

    layers = []
    d_in = INPUT_SIZE
    for _ in range(NUM_LAYERS):
        key, k1, k2, k3, k4 = jax.random.split(key, 5)
        layers.append((unif(k1, (3 * HIDDEN, d_in)),     # weight_ih_l{k}
                       unif(k2, (3 * HIDDEN, HIDDEN)),   # weight_hh_l{k}
                       unif(k3, (3 * HIDDEN,)),          # bias_ih_l{k}
                       unif(k4, (3 * HIDDEN,))))         # bias_hh_l{k}
        d_in = HIDDEN

    key, k5, k6 = jax.random.split(key, 3)
    wfc = unif(k5, (OUT_SIZE, HIDDEN))                   # fc.weight
    bfc = unif(k6, (OUT_SIZE,))                          # fc.bias
    return {'layers': layers, 'wfc': wfc, 'bfc': bfc}


# ----------------------------- pure-JAX reference ----------------------------
def reference_forward(x, params):
    B, S, _ = x.shape
    seq_in = x
    for (wih, whh, bih, bhh) in params['layers']:
        H = whh.shape[-1]
        h = jnp.zeros((B, H), jnp.float32)
        hs = []
        for t in range(S):
            gi = seq_in[:, t, :] @ wih.T + bih
            gh = h @ whh.T + bhh
            xr, xz, xn = jnp.split(gi, 3, axis=-1)
            hr, hz, hn = jnp.split(gh, 3, axis=-1)
            r = jax.nn.sigmoid(xr + hr)
            z = jax.nn.sigmoid(xz + hz)
            n = jnp.tanh(xn + r * hn)
            h = (1.0 - z) * n + z * h
            hs.append(h)
        seq_in = jnp.stack(hs, axis=1)
    return seq_in[:, -1, :] @ params['wfc'].T + params['bfc']


# ----------------------------- main ------------------------------------------
if __name__ == "__main__":
    key = jax.random.PRNGKey(0)
    k_x, k_p = jax.random.split(key)
    x = jax.random.normal(k_x, (BATCH, SEQ, INPUT_SIZE), dtype=jnp.float32)
    params = init_params(k_p)
    packed = pack_params(params, input_size=INPUT_SIZE, hidden=HIDDEN,
                         hidden_pad=HIDDEN_PAD, out_size=OUT_SIZE)

    out = gru_model_forward(x, packed)
    out = jax.block_until_ready(out)

    ref = reference_forward(x, params)
    assert out.shape == (BATCH, OUT_SIZE)
    assert jnp.allclose(out, ref, atol=1e-3, rtol=1e-3), "mismatch vs JAX reference"

    print("KERNEL_OK")
</pallas_src>

<mosaic_0001>
module attributes {stable_mosaic.version = 11 : i64} {
  func.func @gru_forward_kernel(%arg0: memref<16x32xf32, #tpu.memory_space<vmem>>, %arg1: memref<312x384xf32, #tpu.memory_space<vmem>>, %arg2: memref<2x8xf32, #tpu.memory_space<vmem>>) attributes {dimension_semantics = [], scalar_prefetch = 0 : i64, scratch_operands = 0 : i64, tpu.core_type = #tpu.core_type<tc>} {
    %c0 = arith.constant 0 : index
    %c0_0 = arith.constant 0 : index
    %0 = vector.load %arg0[%c0, %c0_0] : memref<16x32xf32, #tpu.memory_space<vmem>>, vector<16x32xf32>
    %c0_1 = arith.constant 0 : index
    %c0_2 = arith.constant 0 : index
    %1 = vector.load %arg1[%c0_1, %c0_2] : memref<312x384xf32, #tpu.memory_space<vmem>>, vector<32x384xf32>
    %c32 = arith.constant 32 : index
    %c0_3 = arith.constant 0 : index
    %2 = vector.load %arg1[%c32, %c0_3] : memref<312x384xf32, #tpu.memory_space<vmem>>, vector<128x384xf32>
    %c160 = arith.constant 160 : index
    %c0_4 = arith.constant 0 : index
    %3 = vector.load %arg1[%c160, %c0_4] : memref<312x384xf32, #tpu.memory_space<vmem>>, vector<1x384xf32>
    %c168 = arith.constant 168 : index
    %c256 = arith.constant 256 : index
    %4 = vector.load %arg1[%c168, %c256] : memref<312x384xf32, #tpu.memory_space<vmem>>, vector<1x128xf32>
    %cst = arith.constant dense<0.000000e+00> : vector<16x384xf32>
    %5 = tpu.matmul %0, %1, %cst {dimension_numbers = #tpu.dot_dimension_numbers<[1], [0], [0], [1], [0, 0, 1, 1], [], []>} : vector<16x32xf32>, vector<32x384xf32>, vector<16x384xf32> -> vector<16x384xf32>
    %6 = vector.broadcast %3 : vector<1x384xf32> to vector<16x384xf32>
    %7 = arith.addf %5, %6 : vector<16x384xf32>
    %8 = vector.shape_cast %4 : vector<1x128xf32> to vector<1x128xf32>
    %9 = vector.broadcast %8 : vector<1x128xf32> to vector<2x128xf32>
    %cst_5 = arith.constant 0.000000e+00 : f32
    %10 = vector.broadcast %cst_5 : f32 to vector<2x128xf32>
    %11 = vector.extract_strided_slice %7 {offsets = [0, 0], sizes = [2, 384], strides = [1, 1]} : vector<16x384xf32> to vector<2x384xf32>
    %cst_6 = arith.constant dense<0.000000e+00> : vector<2x384xf32>
    %12 = tpu.matmul %10, %2, %cst_6 {dimension_numbers = #tpu.dot_dimension_numbers<[1], [0], [0], [1], [0, 0, 1, 1], [], []>} : vector<2x128xf32>, vector<128x384xf32>, vector<2x384xf32> -> vector<2x384xf32>
    %13 = vector.extract_strided_slice %11 {offsets = [0, 0], sizes = [2, 128], strides = [1, 1]} : vector<2x384xf32> to vector<2x128xf32>
    %14 = vector.extract_strided_slice %12 {offsets = [0, 0], sizes = [2, 128], strides = [1, 1]} : vector<2x384xf32> to vector<2x128xf32>
    %15 = arith.addf %13, %14 : vector<2x128xf32>
    %16 = arith.negf %15 : vector<2x128xf32>
    %17 = math.exp %16 : vector<2x128xf32>
    %cst_7 = arith.constant 1.000000e+00 : f32
    %18 = vector.broadcast %cst_7 : f32 to vector<2x128xf32>
    %19 = arith.addf %18, %17 : vector<2x128xf32>
    %20 = arith.divf %18, %19 : vector<2x128xf32>
    %21 = vector.extract_strided_slice %11 {offsets = [0, 128], sizes = [2, 128], strides = [1, 1]} : vector<2x384xf32> to vector<2x128xf32>
    %22 = vector.extract_strided_slice %12 {offsets = [0, 128], sizes = [2, 128], strides = [1, 1]} : vector<2x384xf32> to vector<2x128xf32>
    %23 = arith.addf %21, %22 : vector<2x128xf32>
    %24 = arith.negf %23 : vector<2x128xf32>
    %25 = math.exp %24 : vector<2x128xf32>
    %cst_8 = arith.constant 1.000000e+00 : f32
    %26 = vector.broadcast %cst_8 : f32 to vector<2x128xf32>
    %27 = arith.addf %26, %25 : vector<2x128xf32>
    %28 = arith.divf %26, %27 : vector<2x128xf32>
    %29 = vector.extract_strided_slice %11 {offsets = [0, 256], sizes = [2, 128], strides = [1, 1]} : vector<2x384xf32> to vector<2x128xf32>
    %30 = vector.extract_strided_slice %12 {offsets = [0, 256], sizes = [2, 128], strides = [1, 1]} : vector<2x384xf32> to vector<2x128xf32>
    %31 = arith.addf %30, %9 : vector<2x128xf32>
    %32 = arith.mulf %20, %31 : vector<2x128xf32>
    %33 = arith.addf %29, %32 : vector<2x128xf32>
    %34 = math.tanh %33 : vector<2x128xf32>
    %cst_9 = arith.constant 1.000000e+00 : f32
    %35 = vector.broadcast %cst_9 : f32 to vector<2x128xf32>
    %36 = arith.subf %35, %28 : vector<2x128xf32>
    %37 = arith.mulf %36, %34 : vector<2x128xf32>
    %38 = arith.mulf %28, %10 : vector<2x128xf32>
    %39 = arith.addf %37, %38 : vector<2x128xf32>
    %40 = vector.extract_strided_slice %7 {offsets = [2, 0], sizes = [2, 384], strides = [1, 1]} : vector<16x384xf32> to vector<2x384xf32>
    %cst_10 = arith.constant dense<0.000000e+00> : vector<2x384xf32>
    %41 = tpu.matmul %39, %2, %cst_10 {dimension_numbers = #tpu.dot_dimension_numbers<[1], [0], [0], [1], [0, 0, 1, 1], [], []>} : vector<2x128xf32>, vector<128x384xf32>, vector<2x384xf32> -> vector<2x384xf32>
    %42 = vector.extract_strided_slice %40 {offsets = [0, 0], sizes = [2, 128], strides = [1, 1]} : vector<2x384xf32> to vector<2x128xf32>
    %43 = vector.extract_strided_slice %41 {offsets = [0, 0], sizes = [2, 128], strides = [1, 1]} : vector<2x384xf32> to vector<2x128xf32>
    %44 = arith.addf %42, %43 : vector<2x128xf32>
    %45 = arith.negf %44 : vector<2x128xf32>
    %46 = math.exp %45 : vector<2x128xf32>
    %cst_11 = arith.constant 1.000000e+00 : f32
    %47 = vector.broadcast %cst_11 : f32 to vector<2x128xf32>
    %48 = arith.addf %47, %46 : vector<2x128xf32>
    %49 = arith.divf %47, %48 : vector<2x128xf32>
    %50 = vector.extract_strided_slice %40 {offsets = [0, 128], sizes = [2, 128], strides = [1, 1]} : vector<2x384xf32> to vector<2x128xf32>
    %51 = vector.extract_strided_slice %41 {offsets = [0, 128], sizes = [2, 128], strides = [1, 1]} : vector<2x384xf32> to vector<2x128xf32>
    %52 = arith.addf %50, %51 : vector<2x128xf32>
    %53 = arith.negf %52 : vector<2x128xf32>
    %54 = math.exp %53 : vector<2x128xf32>
    %cst_12 = arith.constant 1.000000e+00 : f32
    %55 = vector.broadcast %cst_12 : f32 to vector<2x128xf32>
    %56 = arith.addf %55, %54 : vector<2x128xf32>
    %57 = arith.divf %55, %56 : vector<2x128xf32>
    %58 = vector.extract_strided_slice %40 {offsets = [0, 256], sizes = [2, 128], strides = [1, 1]} : vector<2x384xf32> to vector<2x128xf32>
    %59 = vector.extract_strided_slice %41 {offsets = [0, 256], sizes = [2, 128], strides = [1, 1]} : vector<2x384xf32> to vector<2x128xf32>
    %60 = arith.addf %59, %9 : vector<2x128xf32>
    %61 = arith.mulf %49, %60 : vector<2x128xf32>
    %62 = arith.addf %58, %61 : vector<2x128xf32>
    %63 = math.tanh %62 : vector<2x128xf32>
    %cst_13 = arith.constant 1.000000e+00 : f32
    %64 = vector.broadcast %cst_13 : f32 to vector<2x128xf32>
    %65 = arith.subf %64, %57 : vector<2x128xf32>
    %66 = arith.mulf %65, %63 : vector<2x128xf32>
    %67 = arith.mulf %57, %39 : vector<2x128xf32>
    %68 = arith.addf %66, %67 : vector<2x128xf32>
    %69 = vector.extract_strided_slice %7 {offsets = [4, 0], sizes = [2, 384], strides = [1, 1]} : vector<16x384xf32> to vector<2x384xf32>
    %cst_14 = arith.constant dense<0.000000e+00> : vector<2x384xf32>
    %70 = tpu.matmul %68, %2, %cst_14 {dimension_numbers = #tpu.dot_dimension_numbers<[1], [0], [0], [1], [0, 0, 1, 1], [], []>} : vector<2x128xf32>, vector<128x384xf32>, vector<2x384xf32> -> vector<2x384xf32>
    %71 = vector.extract_strided_slice %69 {offsets = [0, 0], sizes = [2, 128], strides = [1, 1]} : vector<2x384xf32> to vector<2x128xf32>
    %72 = vector.extract_strided_slice %70 {offsets = [0, 0], sizes = [2, 128], strides = [1, 1]} : vector<2x384xf32> to vector<2x128xf32>
    %73 = arith.addf %71, %72 : vector<2x128xf32>
    %74 = arith.negf %73 : vector<2x128xf32>
    %75 = math.exp %74 : vector<2x128xf32>
    %cst_15 = arith.constant 1.000000e+00 : f32
    %76 = vector.broadcast %cst_15 : f32 to vector<2x128xf32>
    %77 = arith.addf %76, %75 : vector<2x128xf32>
    %78 = arith.divf %76, %77 : vector<2x128xf32>
    %79 = vector.extract_strided_slice %69 {offsets = [0, 128], sizes = [2, 128], strides = [1, 1]} : vector<2x384xf32> to vector<2x128xf32>
    %80 = vector.extract_strided_slice %70 {offsets = [0, 128], sizes = [2, 128], strides = [1, 1]} : vector<2x384xf32> to vector<2x128xf32>
    %81 = arith.addf %79, %80 : vector<2x128xf32>
    %82 = arith.negf %81 : vector<2x128xf32>
    %83 = math.exp %82 : vector<2x128xf32>
    %cst_16 = arith.constant 1.000000e+00 : f32
    %84 = vector.broadcast %cst_16 : f32 to vector<2x128xf32>
    %85 = arith.addf %84, %83 : vector<2x128xf32>
    %86 = arith.divf %84, %85 : vector<2x128xf32>
    %87 = vector.extract_strided_slice %69 {offsets = [0, 256], sizes = [2, 128], strides = [1, 1]} : vector<2x384xf32> to vector<2x128xf32>
    %88 = vector.extract_strided_slice %70 {offsets = [0, 256], sizes = [2, 128], strides = [1, 1]} : vector<2x384xf32> to vector<2x128xf32>
    %89 = arith.addf %88, %9 : vector<2x128xf32>
    %90 = arith.mulf %78, %89 : vector<2x128xf32>
    %91 = arith.addf %87, %90 : vector<2x128xf32>
    %92 = math.tanh %91 : vector<2x128xf32>
    %cst_17 = arith.constant 1.000000e+00 : f32
    %93 = vector.broadcast %cst_17 : f32 to vector<2x128xf32>
    %94 = arith.subf %93, %86 : vector<2x128xf32>
    %95 = arith.mulf %94, %92 : vector<2x128xf32>
    %96 = arith.mulf %86, %68 : vector<2x128xf32>
    %97 = arith.addf %95, %96 : vector<2x128xf32>
    %98 = vector.extract_strided_slice %7 {offsets = [6, 0], sizes = [2, 384], strides = [1, 1]} : vector<16x384xf32> to vector<2x384xf32>
    %cst_18 = arith.constant dense<0.000000e+00> : vector<2x384xf32>
    %99 = tpu.matmul %97, %2, %cst_18 {dimension_numbers = #tpu.dot_dimension_numbers<[1], [0], [0], [1], [0, 0, 1, 1], [], []>} : vector<2x128xf32>, vector<128x384xf32>, vector<2x384xf32> -> vector<2x384xf32>
    %100 = vector.extract_strided_slice %98 {offsets = [0, 0], sizes = [2, 128], strides = [1, 1]} : vector<2x384xf32> to vector<2x128xf32>
    %101 = vector.extract_strided_slice %99 {offsets = [0, 0], sizes = [2, 128], strides = [1, 1]} : vector<2x384xf32> to vector<2x128xf32>
    %102 = arith.addf %100, %101 : vector<2x128xf32>
    %103 = arith.negf %102 : vector<2x128xf32>
    %104 = math.exp %103 : vector<2x128xf32>
    %cst_19 = arith.constant 1.000000e+00 : f32
    %105 = vector.broadcast %cst_19 : f32 to vector<2x128xf32>
    %106 = arith.addf %105, %104 : vector<2x128xf32>
    %107 = arith.divf %105, %106 : vector<2x128xf32>
    %108 = vector.extract_strided_slice %98 {offsets = [0, 128], sizes = [2, 128], strides = [1, 1]} : vector<2x384xf32> to vector<2x128xf32>
    %109 = vector.extract_strided_slice %99 {offsets = [0, 128], sizes = [2, 128], strides = [1, 1]} : vector<2x384xf32> to vector<2x128xf32>
    %110 = arith.addf %108, %109 : vector<2x128xf32>
    %111 = arith.negf %110 : vector<2x128xf32>
    %112 = math.exp %111 : vector<2x128xf32>
    %cst_20 = arith.constant 1.000000e+00 : f32
    %113 = vector.broadcast %cst_20 : f32 to vector<2x128xf32>
    %114 = arith.addf %113, %112 : vector<2x128xf32>
    %115 = arith.divf %113, %114 : vector<2x128xf32>
    %116 = vector.extract_strided_slice %98 {offsets = [0, 256], sizes = [2, 128], strides = [1, 1]} : vector<2x384xf32> to vector<2x128xf32>
    %117 = vector.extract_strided_slice %99 {offsets = [0, 256], sizes = [2, 128], strides = [1, 1]} : vector<2x384xf32> to vector<2x128xf32>
    %118 = arith.addf %117, %9 : vector<2x128xf32>
    %119 = arith.mulf %107, %118 : vector<2x128xf32>
    %120 = arith.addf %116, %119 : vector<2x128xf32>
    %121 = math.tanh %120 : vector<2x128xf32>
    %cst_21 = arith.constant 1.000000e+00 : f32
    %122 = vector.broadcast %cst_21 : f32 to vector<2x128xf32>
    %123 = arith.subf %122, %115 : vector<2x128xf32>
    %124 = arith.mulf %123, %121 : vector<2x128xf32>
    %125 = arith.mulf %115, %97 : vector<2x128xf32>
    %126 = arith.addf %124, %125 : vector<2x128xf32>
    %127 = vector.extract_strided_slice %7 {offsets = [8, 0], sizes = [2, 384], strides = [1, 1]} : vector<16x384xf32> to vector<2x384xf32>
    %cst_22 = arith.constant dense<0.000000e+00> : vector<2x384xf32>
    %128 = tpu.matmul %126, %2, %cst_22 {dimension_numbers = #tpu.dot_dimension_numbers<[1], [0], [0], [1], [0, 0, 1, 1], [], []>} : vector<2x128xf32>, vector<128x384xf32>, vector<2x384xf32> -> vector<2x384xf32>
    %129 = vector.extract_strided_slice %127 {offsets = [0, 0], sizes = [2, 128], strides = [1, 1]} : vector<2x384xf32> to vector<2x128xf32>
    %130 = vector.extract_strided_slice %128 {offsets = [0, 0], sizes = [2, 128], strides = [1, 1]} : vector<2x384xf32> to vector<2x128xf32>
    %131 = arith.addf %129, %130 : vector<2x128xf32>
    %132 = arith.negf %131 : vector<2x128xf32>
    %133 = math.exp %132 : vector<2x128xf32>
    %cst_23 = arith.constant 1.000000e+00 : f32
    %134 = vector.broadcast %cst_23 : f32 to vector<2x128xf32>
    %135 = arith.addf %134, %133 : vector<2x128xf32>
    %136 = arith.divf %134, %135 : vector<2x128xf32>
    %137 = vector.extract_strided_slice %127 {offsets = [0, 128], sizes = [2, 128], strides = [1, 1]} : vector<2x384xf32> to vector<2x128xf32>
    %138 = vector.extract_strided_slice %128 {offsets = [0, 128], sizes = [2, 128], strides = [1, 1]} : vector<2x384xf32> to vector<2x128xf32>
    %139 = arith.addf %137, %138 : vector<2x128xf32>
    %140 = arith.negf %139 : vector<2x128xf32>
    %141 = math.exp %140 : vector<2x128xf32>
    %cst_24 = arith.constant 1.000000e+00 : f32
    %142 = vector.broadcast %cst_24 : f32 to vector<2x128xf32>
    %143 = arith.addf %142, %141 : vector<2x128xf32>
    %144 = arith.divf %142, %143 : vector<2x128xf32>
    %145 = vector.extract_strided_slice %127 {offsets = [0, 256], sizes = [2, 128], strides = [1, 1]} : vector<2x384xf32> to vector<2x128xf32>
    %146 = vector.extract_strided_slice %128 {offsets = [0, 256], sizes = [2, 128], strides = [1, 1]} : vector<2x384xf32> to vector<2x128xf32>
    %147 = arith.addf %146, %9 : vector<2x128xf32>
    %148 = arith.mulf %136, %147 : vector<2x128xf32>
    %149 = arith.addf %145, %148 : vector<2x128xf32>
    %150 = math.tanh %149 : vector<2x128xf32>
    %cst_25 = arith.constant 1.000000e+00 : f32
    %151 = vector.broadcast %cst_25 : f32 to vector<2x128xf32>
    %152 = arith.subf %151, %144 : vector<2x128xf32>
    %153 = arith.mulf %152, %150 : vector<2x128xf32>
    %154 = arith.mulf %144, %126 : vector<2x128xf32>
    %155 = arith.addf %153, %154 : vector<2x128xf32>
    %156 = vector.extract_strided_slice %7 {offsets = [10, 0], sizes = [2, 384], strides = [1, 1]} : vector<16x384xf32> to vector<2x384xf32>
    %cst_26 = arith.constant dense<0.000000e+00> : vector<2x384xf32>
    %157 = tpu.matmul %155, %2, %cst_26 {dimension_numbers = #tpu.dot_dimension_numbers<[1], [0], [0], [1], [0, 0, 1, 1], [], []>} : vector<2x128xf32>, vector<128x384xf32>, vector<2x384xf32> -> vector<2x384xf32>
    %158 = vector.extract_strided_slice %156 {offsets = [0, 0], sizes = [2, 128], strides = [1, 1]} : vector<2x384xf32> to vector<2x128xf32>
    %159 = vector.extract_strided_slice %157 {offsets = [0, 0], sizes = [2, 128], strides = [1, 1]} : vector<2x384xf32> to vector<2x128xf32>
    %160 = arith.addf %158, %159 : vector<2x128xf32>
    %161 = arith.negf %160 : vector<2x128xf32>
    %162 = math.exp %161 : vector<2x128xf32>
    %cst_27 = arith.constant 1.000000e+00 : f32
    %163 = vector.broadcast %cst_27 : f32 to vector<2x128xf32>
    %164 = arith.addf %163, %162 : vector<2x128xf32>
    %165 = arith.divf %163, %164 : vector<2x128xf32>
    %166 = vector.extract_strided_slice %156 {offsets = [0, 128], sizes = [2, 128], strides = [1, 1]} : vector<2x384xf32> to vector<2x128xf32>
    %167 = vector.extract_strided_slice %157 {offsets = [0, 128], sizes = [2, 128], strides = [1, 1]} : vector<2x384xf32> to vector<2x128xf32>
    %168 = arith.addf %166, %167 : vector<2x128xf32>
    %169 = arith.negf %168 : vector<2x128xf32>
    %170 = math.exp %169 : vector<2x128xf32>
    %cst_28 = arith.constant 1.000000e+00 : f32
    %171 = vector.broadcast %cst_28 : f32 to vector<2x128xf32>
    %172 = arith.addf %171, %170 : vector<2x128xf32>
    %173 = arith.divf %171, %172 : vector<2x128xf32>
    %174 = vector.extract_strided_slice %156 {offsets = [0, 256], sizes = [2, 128], strides = [1, 1]} : vector<2x384xf32> to vector<2x128xf32>
    %175 = vector.extract_strided_slice %157 {offsets = [0, 256], sizes = [2, 128], strides = [1, 1]} : vector<2x384xf32> to vector<2x128xf32>
    %176 = arith.addf %175, %9 : vector<2x128xf32>
    %177 = arith.mulf %165, %176 : vector<2x128xf32>
    %178 = arith.addf %174, %177 : vector<2x128xf32>
    %179 = math.tanh %178 : vector<2x128xf32>
    %cst_29 = arith.constant 1.000000e+00 : f32
    %180 = vector.broadcast %cst_29 : f32 to vector<2x128xf32>
    %181 = arith.subf %180, %173 : vector<2x128xf32>
    %182 = arith.mulf %181, %179 : vector<2x128xf32>
    %183 = arith.mulf %173, %155 : vector<2x128xf32>
    %184 = arith.addf %182, %183 : vector<2x128xf32>
    %185 = vector.extract_strided_slice %7 {offsets = [12, 0], sizes = [2, 384], strides = [1, 1]} : vector<16x384xf32> to vector<2x384xf32>
    %cst_30 = arith.constant dense<0.000000e+00> : vector<2x384xf32>
    %186 = tpu.matmul %184, %2, %cst_30 {dimension_numbers = #tpu.dot_dimension_numbers<[1], [0], [0], [1], [0, 0, 1, 1], [], []>} : vector<2x128xf32>, vector<128x384xf32>, vector<2x384xf32> -> vector<2x384xf32>
    %187 = vector.extract_strided_slice %185 {offsets = [0, 0], sizes = [2, 128], strides = [1, 1]} : vector<2x384xf32> to vector<2x128xf32>
    %188 = vector.extract_strided_slice %186 {offsets = [0, 0], sizes = [2, 128], strides = [1, 1]} : vector<2x384xf32> to vector<2x128xf32>
    %189 = arith.addf %187, %188 : vector<2x128xf32>
    %190 = arith.negf %189 : vector<2x128xf32>
    %191 = math.exp %190 : vector<2x128xf32>
    %cst_31 = arith.constant 1.000000e+00 : f32
    %192 = vector.broadcast %cst_31 : f32 to vector<2x128xf32>
    %193 = arith.addf %192, %191 : vector<2x128xf32>
    %194 = arith.divf %192, %193 : vector<2x128xf32>
    %195 = vector.extract_strided_slice %185 {offsets = [0, 128], sizes = [2, 128], strides = [1, 1]} : vector<2x384xf32> to vector<2x128xf32>
    %196 = vector.extract_strided_slice %186 {offsets = [0, 128], sizes = [2, 128], strides = [1, 1]} : vector<2x384xf32> to vector<2x128xf32>
    %197 = arith.addf %195, %196 : vector<2x128xf32>
    %198 = arith.negf %197 : vector<2x128xf32>
    %199 = math.exp %198 : vector<2x128xf32>
    %cst_32 = arith.constant 1.000000e+00 : f32
    %200 = vector.broadcast %cst_32 : f32 to vector<2x128xf32>
    %201 = arith.addf %200, %199 : vector<2x128xf32>
    %202 = arith.divf %200, %201 : vector<2x128xf32>
    %203 = vector.extract_strided_slice %185 {offsets = [0, 256], sizes = [2, 128], strides = [1, 1]} : vector<2x384xf32> to vector<2x128xf32>
    %204 = vector.extract_strided_slice %186 {offsets = [0, 256], sizes = [2, 128], strides = [1, 1]} : vector<2x384xf32> to vector<2x128xf32>
    %205 = arith.addf %204, %9 : vector<2x128xf32>
    %206 = arith.mulf %194, %205 : vector<2x128xf32>
    %207 = arith.addf %203, %206 : vector<2x128xf32>
    %208 = math.tanh %207 : vector<2x128xf32>
    %cst_33 = arith.constant 1.000000e+00 : f32
    %209 = vector.broadcast %cst_33 : f32 to vector<2x128xf32>
    %210 = arith.subf %209, %202 : vector<2x128xf32>
    %211 = arith.mulf %210, %208 : vector<2x128xf32>
    %212 = arith.mulf %202, %184 : vector<2x128xf32>
    %213 = arith.addf %211, %212 : vector<2x128xf32>
    %214 = vector.extract_strided_slice %7 {offsets = [14, 0], sizes = [2, 384], strides = [1, 1]} : vector<16x384xf32> to vector<2x384xf32>
    %cst_34 = arith.constant dense<0.000000e+00> : vector<2x384xf32>
    %215 = tpu.matmul %213, %2, %cst_34 {dimension_numbers = #tpu.dot_dimension_numbers<[1], [0], [0], [1], [0, 0, 1, 1], [], []>} : vector<2x128xf32>, vector<128x384xf32>, vector<2x384xf32> -> vector<2x384xf32>
    %216 = vector.extract_strided_slice %214 {offsets = [0, 0], sizes = [2, 128], strides = [1, 1]} : vector<2x384xf32> to vector<2x128xf32>
    %217 = vector.extract_strided_slice %215 {offsets = [0, 0], sizes = [2, 128], strides = [1, 1]} : vector<2x384xf32> to vector<2x128xf32>
    %218 = arith.addf %216, %217 : vector<2x128xf32>
    %219 = arith.negf %218 : vector<2x128xf32>
    %220 = math.exp %219 : vector<2x128xf32>
    %cst_35 = arith.constant 1.000000e+00 : f32
    %221 = vector.broadcast %cst_35 : f32 to vector<2x128xf32>
    %222 = arith.addf %221, %220 : vector<2x128xf32>
    %223 = arith.divf %221, %222 : vector<2x128xf32>
    %224 = vector.extract_strided_slice %214 {offsets = [0, 128], sizes = [2, 128], strides = [1, 1]} : vector<2x384xf32> to vector<2x128xf32>
    %225 = vector.extract_strided_slice %215 {offsets = [0, 128], sizes = [2, 128], strides = [1, 1]} : vector<2x384xf32> to vector<2x128xf32>
    %226 = arith.addf %224, %225 : vector<2x128xf32>
    %227 = arith.negf %226 : vector<2x128xf32>
    %228 = math.exp %227 : vector<2x128xf32>
    %cst_36 = arith.constant 1.000000e+00 : f32
    %229 = vector.broadcast %cst_36 : f32 to vector<2x128xf32>
    %230 = arith.addf %229, %228 : vector<2x128xf32>
    %231 = arith.divf %229, %230 : vector<2x128xf32>
    %232 = vector.extract_strided_slice %214 {offsets = [0, 256], sizes = [2, 128], strides = [1, 1]} : vector<2x384xf32> to vector<2x128xf32>
    %233 = vector.extract_strided_slice %215 {offsets = [0, 256], sizes = [2, 128], strides = [1, 1]} : vector<2x384xf32> to vector<2x128xf32>
    %234 = arith.addf %233, %9 : vector<2x128xf32>
    %235 = arith.mulf %223, %234 : vector<2x128xf32>
    %236 = arith.addf %232, %235 : vector<2x128xf32>
    %237 = math.tanh %236 : vector<2x128xf32>
    %cst_37 = arith.constant 1.000000e+00 : f32
    %238 = vector.broadcast %cst_37 : f32 to vector<2x128xf32>
    %239 = arith.subf %238, %231 : vector<2x128xf32>
    %240 = arith.mulf %239, %237 : vector<2x128xf32>
    %241 = arith.mulf %231, %213 : vector<2x128xf32>
    %242 = arith.addf %240, %241 : vector<2x128xf32>
    %c176 = arith.constant 176 : index
    %c0_38 = arith.constant 0 : index
    %243 = vector.load %arg1[%c176, %c0_38] : memref<312x384xf32, #tpu.memory_space<vmem>>, vector<128x8xf32>
    %c304 = arith.constant 304 : index
    %c0_39 = arith.constant 0 : index
    %244 = vector.load %arg1[%c304, %c0_39] : memref<312x384xf32, #tpu.memory_space<vmem>>, vector<1x8xf32>
    %cst_40 = arith.constant dense<0.000000e+00> : vector<2x8xf32>
    %245 = tpu.matmul %242, %243, %cst_40 {dimension_numbers = #tpu.dot_dimension_numbers<[1], [0], [0], [1], [0, 0, 1, 1], [], []>} : vector<2x128xf32>, vector<128x8xf32>, vector<2x8xf32> -> vector<2x8xf32>
    %246 = vector.broadcast %244 : vector<1x8xf32> to vector<2x8xf32>
    %247 = arith.addf %245, %246 : vector<2x8xf32>
    %c0_41 = arith.constant 0 : index
    %c0_42 = arith.constant 0 : index
    %248 = vector.load %arg2[%c0_41, %c0_42] : memref<2x8xf32, #tpu.memory_space<vmem>>, vector<2x8xf32>
    tpu.vector_store %arg2[%c0_41, %c0_42], %247 {strides = array<i32>} : memref<2x8xf32, #tpu.memory_space<vmem>>, vector<2x8xf32>,
    return
  }
}

</mosaic_0001>

<bundles_post_ra>
// kernel: tpu_custom_call.1
= control target key start
LH: loop header
LB: loop body
LE: loop exit
PB: predicated region body
PF: predicated region fallthrough
CT: control target
= control target key end

     0   :  { %7 = vsyncpa [#allocation3], 0  ;;  %s3395_s0 = inlined_call_operand.hbm [shape: f32[16,32], index: 0, kind: input, shape index: {}]   ;;  %s3396_s1 = inlined_call_operand.hbm [shape: f32[312,384], index: 1, kind: input, shape index: {}]   ;;  %s3397_s2 = inlined_call_operand.hbm [shape: f32[2,8], index: 2, kind: output, shape index: {}]  }
   0x1   :  { %8 = vsyncpa [#allocation6], 0 }
   0x2   :  { %9 = vsyncpa [#allocation4], 0  ;;  %s2930_s9 = smov [#allocation2]   ;;  %s2858_s13 = scalar_lea.hbm %s3395_s0, 256 }
   0x3   :  { %s15_s10 = sshll.u32 %s2930_s9, 4  ;;  %p2859_p0 = scmp.ne.s32.totalorder %s3395_s0, %s2858_s13  ;;  %s16_s10 = int_to_ptr.vmem [resolvable:$true] %s15_s10 }
   0x4   :  { %p2862_p1 = scmp.lt.u32.totalorder %s2858_s13, %s3395_s0 }
   0x6   :  { %p2864_p2 = pnand %p2862_p1, %p2859_p0 }
   0x8   :  { %2867 = shalt.err (!%p2864_p2)
}
   0x9   :  { %s2868_s18 = scalar_lea.vmem %s16_s10, 256  ;;  %p2873_p4 = scmp.lt.s32.totalorder %s16_s10, %s16_s10 }
   0xa   :  { %p2869_p3 = scmp.ne.s32.totalorder %s16_s10, %s2868_s18  ;;  %p2874_p5 = scmp.lt.s32.totalorder %s2868_s18, %s2868_s18 }
   0xc   :  { %p2875_p6 = por %p2874_p5, %p2873_p4 }
   0xe   :  { %p2876_p7 = pnand %p2875_p6, %p2869_p3 }
  0x10   :  { %2879 = shalt.err (!%p2876_p7)
}
  0x11   :  { %s2931_s19 = smov 128   ;;  %s2932_s20 = smov 8  }
  0x12   :  { %21 = dma.hbm_to_vmem [thread:$0]  %s3395_s0, 256, %s16_s10, [#allocation3], %s2931_s19, %s2931_s19, %s2932_s20  }
  0x13   :  { %s2933_s23 = smov [#allocation5]   ;;  %s2880_s27 = scalar_lea.hbm %s3396_s1, 14976 }
  0x14   :  { %s27_s24 = sshll.u32 %s2933_s23, 4  ;;  %p2881_p8 = scmp.ne.s32.totalorder %s3396_s1, %s2880_s27  ;;  %s28_s24 = int_to_ptr.vmem [resolvable:$true] %s27_s24 }
  0x15   :  { %p2884_p9 = scmp.lt.u32.totalorder %s2880_s27, %s3396_s1 }
  0x17   :  { %p2886_p10 = pnand %p2884_p9, %p2881_p8 }
  0x19   :  { %2889 = shalt.err (!%p2886_p10)
}
  0x1a   :  { %s2890_s4 = scalar_lea.vmem %s28_s24, 14976  ;;  %p2895_p12 = scmp.lt.s32.totalorder %s28_s24, %s28_s24 }
  0x1b   :  { %p2891_p11 = scmp.ne.s32.totalorder %s28_s24, %s2890_s4  ;;  %p2896_p13 = scmp.lt.s32.totalorder %s2890_s4, %s2890_s4 }
  0x1d   :  { %p2897_p0 = por %p2896_p13, %p2895_p12 }
  0x1f   :  { %p2898_p1 = pnand %p2897_p0, %p2891_p11 }
  0x21   :  { %2901 = shalt.err (!%p2898_p1)
}
  0x22   :  { %s2934_s0 = smov 384   ;;  %s2935_s5 = smov 24  }
  0x23   :  { %33 = dma.hbm_to_vmem [thread:$0]  %s3396_s1, 14976, %s28_s24, [#allocation6], %s2934_s0, %s2934_s0, %s2935_s5  }
  0x24   :  { %2924 = dma.done.wait [#allocation3], 256  }
  0x25   :  { %2925 = vsyncadd [#allocation3], 4294967040 }
  0x26   :  { %2926 = dma.done.wait [#allocation6], 14976  }
  0x27   :  { %2927 = vsyncadd [#allocation6], 4294952320  ;;  %v2936_v0 = vmov 0.0   ;;  %v55_v1 = vld [vmem:[#allocation5 + $0x68] sm:$0xff]  ;;  %v58_v2 = vld [vmem:[#allocation5 + $0x80] sm:$0xff]  ;;  %vm121_vm0 = vcmask 261120  }
  0x28   :  { %192 = vmatprep.mubr.f32.mxu1 %v2936_v0  ;;  %344 = vmatprep.mubr.f32.mxu0 %v2936_v0  ;;  %v54_v3 = vld [vmem:[#allocation5 + $0x60] sm:$0xff]  ;;  %v2981_v4 = vpack.c.bf16 %v58_v2, %v55_v1  ;;  %v57_v5 = vld [vmem:[#allocation5 + $0x78] sm:$0xff]  ;;  %v64_v7 = vld [vmem:[#allocation5 + $0xb0] sm:$0xff]  ;;  %vm2938_vm1 = vmmov 0   ;;  %s2939_s1 = smov [#allocation7]   ;;  %vm1757_vm2 = vcmask 58368  }
  0x29   :  { %v61_v6 = vld [vmem:[#allocation5 + $0x98] sm:$0xff]  ;;  %v2983_v8 = vpack.c.bf16 %v57_v5, %v54_v3  ;;  %v60_v10 = vld [vmem:[#allocation5 + $0x90] sm:$0xff]  ;;  %v63_v11 = vld [vmem:[#allocation5 + $0xa8] sm:$0xff]  ;;  %v2937_v5 = vmov 0.0|0.0   ;;  %s1765_s8 = sshll.u32 %s2939_s1, 4  ;;  %s1766_s8 = int_to_ptr.vmem [resolvable:$true] %s1765_s8 }
  0x2a   :  { %v2985_v9 = vpack.c.bf16 %v64_v7, %v61_v6  ;;  %v67_v12 = vld [vmem:[#allocation5 + $0xc8] sm:$0xff]  ;;  %2297 = vmatprep.subr.bf16.mxu0 %v2981_v4  ;;  %v70_v13 = vld [vmem:[#allocation5 + $0xe0] sm:$0xff]  ;;  %v2989_v16 = vpack.c.bf16 %v63_v11, %v60_v10  ;;  %v69_v21 = vld [vmem:[#allocation5 + $0xd8] sm:$0xff]  ;;  %s2902_s9 = scalar_lea.vmem %s1766_s8, 32  ;;  %p2907_p3 = scmp.lt.s32.totalorder %s1766_s8, %s1766_s8 }
  0x2b   :  { %v43_v14 = vld [vmem:[#allocation5 + $0x8] sm:$0xff]  ;;  %v46_v15 = vld [vmem:[#allocation5 + $0x20] sm:$0xff]  ;;  %2299 = vmatpush1.bf16.msra.mxu0 %v2983_v8  ;;  %v2992_v20 = vpack.c.bf16 %v70_v13, %v67_v12  ;;  %v45_v22 = vld [vmem:[#allocation5 + $0x18] sm:$0xff]  ;;  %p2903_p2 = scmp.ne.s32.totalorder %s1766_s8, %s2902_s9  ;;  %p2908_p4 = scmp.lt.s32.totalorder %s2902_s9, %s2902_s9 }
  0x2c   :  { %v2280_v17 = vpack.c.bf16 %v46_v15, %v43_v14  ;;  %v66_v18 = vld [vmem:[#allocation5 + $0xc0] sm:$0xff]  ;;  %2301 = vmatprep.subr.bf16.mxu0 %v2985_v9  ;;  %v73_v23 = vld [vmem:[#allocation5 + $0xf8] sm:$0xff]  ;;  %v76_v25 = vld [vmem:[#allocation5 + $0x110] sm:$0xff] }
  0x2d   :  { %v42_v19 = vld [vmem:[#allocation5] sm:$0xff]  ;;  %v49_v26 = vld [vmem:[#allocation5 + $0x38] sm:$0xff]  ;;  %v52_v27 = vld [vmem:[#allocation5 + $0x50] sm:$0xff]  ;;  %v2995_v31 = vpack.c.bf16 %v69_v21, %v66_v18  ;;  %v2998_v34 = vpack.c.bf16 %v76_v25, %v73_v23  ;;  %p2909_p5 = por %p2908_p4, %p2907_p3 }
  0x2e   :  { %2281 = vmatprep.subr.bf16.mxu1 %v2280_v17  ;;  %v2282_v24 = vpack.c.bf16 %v45_v22, %v42_v19  ;;  %v2284_v28 = vpack.c.bf16 %v52_v27, %v49_v26  ;;  %v48_v29 = vld [vmem:[#allocation5 + $0x30] sm:$0xff]  ;;  %v51_v30 = vld [vmem:[#allocation5 + $0x48] sm:$0xff]  ;;  %v82_v39 = vld [vmem:[#allocation5 + $0x140] sm:$0xff] }
  0x2f   :  { %2303 = vmatpush1.bf16.msra.mxu0 %v2989_v16  ;;  %v2286_v32 = vpack.c.bf16 %v51_v30, %v48_v29  ;;  %v44_v33 = vld [vmem:[#allocation5 + $0x10] sm:$0xff]  ;;  %v75_v36 = vld [vmem:[#allocation5 + $0x108] sm:$0xff]  ;;  %v50_v41 = vld [vmem:[#allocation5 + $0x40] sm:$0xff]  ;;  %p2910_p6 = pnand %p2909_p5, %p2903_p2 }
  0x30   :  { %2283 = vmatpush1.bf16.msra.mxu1 %v2282_v24  ;;  %2305 = vmatprep.subr.bf16.mxu0 %v2992_v20  ;;  %v72_v35 = vld [vmem:[#allocation5 + $0xf0] sm:$0xff]  ;;  %v47_v37 = vld [vmem:[#allocation5 + $0x28] sm:$0xff]  ;;  %v53_v42 = vld [vmem:[#allocation5 + $0x58] sm:$0xff] }
  0x31   :  { %2285 = vmatprep.subr.bf16.mxu1 %v2284_v28  ;;  %v79_v38 = vld [vmem:[#allocation5 + $0x128] sm:$0xff]  ;;  %v2288_v40 = vpack.c.bf16 %v47_v37, %v44_v33  ;;  %v3001_v43 = vpack.c.bf16 %v75_v36, %v72_v35  ;;  %v40_v44 = vld [vmem:[#allocation2] sm:$0xff]  ;;  %v78_v46 = vld [vmem:[#allocation5 + $0x120] sm:$0xff]  ;;  %v2292_v50 = vpack.c.bf16 %v53_v42, %v50_v41 }
  0x32   :  { %v3004_v45 = vpack.c.bf16 %v82_v39, %v79_v38  ;;  %v81_v47 = vld [vmem:[#allocation5 + $0x138] sm:$0xff]  ;;  %v88_v49 = vld [vmem:[#allocation5 + $0x170] sm:$0xff]  ;;  %v87_v55 = vld [vmem:[#allocation5 + $0x168] sm:$0xff]  ;;  %v106_v38 = vlaneseq }
  0x33   :  { %2307 = vmatpush1.bf16.msra.mxu0 %v2995_v31  ;;  %v85_v48 = vld [vmem:[#allocation5 + $0x158] sm:$0xff]  ;;  %v3008_v51 = vpack.c.bf16 %v81_v47, %v78_v46  ;;  %v84_v52 = vld [vmem:[#allocation5 + $0x150] sm:$0xff]  ;;  %v59_v57 = vld [vmem:[#allocation5 + $0x88] sm:$0xff] }
  0x34   :  { %2287 = vmatpush1.bf16.msra.mxu1 %v2286_v32  ;;  %2309 = vmatprep.subr.bf16.mxu0 %v2998_v34  ;;  %v41_v53 = vld [vmem:[#allocation2 + $0x8] sm:$0xff]  ;;  %v3011_v54 = vpack.c.bf16 %v88_v49, %v85_v48  ;;  %v56_v56 = vld [vmem:[#allocation5 + $0x70] sm:$0xff]  ;;  %v91_v58 = vld [vmem:[#allocation5 + $0x188] sm:$0xff]  ;;  %v3016_v60 = vpack.c.bf16 %v87_v55, %v84_v52  ;;  %v107_v39 = vshrl.u32 %v106_v38, 7 }
  0x35   :  { %2289 = vmatprep.subr.bf16.mxu1 %v2288_v40  ;;  %v94_v59 = vld [vmem:[#allocation5 + $0x1a0] sm:$0xff]  ;;  %v3018_v62 = vpack.c.bf16 %v59_v57, %v56_v56  ;;  %v93_v1 = vld [vmem:[#allocation5 + $0x198] sm:$0xff]  ;;  %v100_v7 = vld [vmem:[#allocation5 + $0x1d0] sm:$0xff] }
  0x36   :  { %v90_v61 = vld [vmem:[#allocation5 + $0x180] sm:$0xff]  ;;  %v3021_v63 = vpack.c.bf16 %v94_v59, %v91_v58  ;;  %v65_v3 = vld [vmem:[#allocation5 + $0xb8] sm:$0xff]  ;;  %v96_v11 = vld [vmem:[#allocation5 + $0x1b0] sm:$0xff]  ;;  %v116_v47 = vsub.s32 2, %v107_v39 }
  0x37   :  { %1775 = vmatmul.mubr.msk.f32.vlgmr.msra.gmra.mrb[0].mxu1 %vm121_vm0, %v40_v44  ;;  %2311 = vmatpush1.bf16.msra.mxu0 %v3001_v43  ;;  %v62_v2 = vld [vmem:[#allocation5 + $0xa0] sm:$0xff]  ;;  %v97_v6 = vld [vmem:[#allocation5 + $0x1b8] sm:$0xff]  ;;  %v3027_v10 = vpack.c.bf16 %v93_v1, %v90_v61  ;;  %v99_v14 = vld [vmem:[#allocation5 + $0x1c8] sm:$0xff] }
  0x38   :  { %2291 = vmatpush3.bf16.msra.mxu1 %v2288_v40  ;;  %2313 = vmatprep.subr.bf16.mxu0 %v3004_v45  ;;  %v3030_v12 = vpack.c.bf16 %v65_v3, %v62_v2  ;;  %v3033_v13 = vpack.c.bf16 %v100_v7, %v97_v6  ;;  %v68_v15 = vld [vmem:[#allocation5 + $0xd0] sm:$0xff]  ;;  %v71_v17 = vld [vmem:[#allocation5 + $0xe8] sm:$0xff]  ;;  %v3039_v18 = vpack.c.bf16 %v99_v14, %v96_v11  ;;  %v74_v21 = vld [vmem:[#allocation5 + $0x100] sm:$0xff]  ;;  %v108_v40 = vsub.s32 0, %v107_v39 }
  0x39   :  { %198 = vmatprep.mubr.f32.mxu1 %v2936_v0  ;;  %2293 = vmatprep.subr.bf16.mxu1 %v2292_v50  ;;  %v3042_v19 = vpack.c.bf16 %v71_v17, %v68_v15  ;;  %v77_v22 = vld [vmem:[#allocation5 + $0x118] sm:$0xff]  ;;  %v80_v24 = vld [vmem:[#allocation5 + $0x130] sm:$0xff]  ;;  %v83_v25 = vld [vmem:[#allocation5 + $0x148] sm:$0xff] }
  0x3a   :  { %v3048_v23 = vpack.c.bf16 %v77_v22, %v74_v21  ;;  %v3054_v26 = vpack.c.bf16 %v83_v25, %v80_v24  ;;  %v86_v27 = vld [vmem:[#allocation5 + $0x160] sm:$0xff]  ;;  %v89_v28 = vld [vmem:[#allocation5 + $0x178] sm:$0xff]  ;;  %v92_v30 = vld [vmem:[#allocation5 + $0x190] sm:$0xff] }
  0x3b   :  { %1776 = vmatmul.mubr.msk.f32.gmra.mrb[2].mxu1 %vm121_vm0, %v41_v53  ;;  %2315 = vmatpush1.bf16.msra.mxu0 %v3008_v51  ;;  %v3061_v29 = vpack.c.bf16 %v89_v28, %v86_v27  ;;  %v95_v32 = vld [vmem:[#allocation5 + $0x1a8] sm:$0xff]  ;;  %v98_v35 = vld [vmem:[#allocation5 + $0x1c0] sm:$0xff]  ;;  %v101_v36 = vld [vmem:[#allocation5 + $0x1d8] sm:$0xff] }
  0x3c   :  { %2295 = vmatpush3.bf16.msra.mxu1 %v2292_v50  ;;  %2317 = vmatprep.subr.bf16.mxu0 %v3011_v54  ;;  %v3067_v33 = vpack.c.bf16 %v95_v32, %v92_v30  ;;  %v3073_v37 = vpack.c.bf16 %v101_v36, %v98_v35  ;;  %v103_v41 = vld [vmem:[#allocation5 + $0x1e0] ss:$8 sm:$0x7] }
  0x3d   :  { %1962 = vmatprep.mubr.msk.f32.mxu1 %vm121_vm0, %v40_v44  ;;  %2328 = vmatprep.subr.bf16.mxu1 %v2937_v5  ;;  %v112_v44 = vsub.s32 1, %v107_v39  ;;  %v109_v48 = vrot.slane %v103_v41, %v108_v40  ;;  %v117_v55 = vrot.slane %v103_v41, %v116_v47  ;;  %v3119_v25 = vld [vmem:[#allocation5 + $0x208] ss:$0 sm:$0xff] }
  0x3f   :  { %1963 = vmatmul.mubr.msk.f32.vlgmr.msra.gmra.mrb[4].mxu1 %vm121_vm0, %v41_v53  ;;  %2319 = vmatpush1.bf16.msra.mxu0 %v3016_v60  ;;  %v113_v49 = vrot.slane %v103_v41, %v112_v44 }
  0x40   :  { %2330 = vmatpush3.bf16.msra.mxu1 %v3018_v62  ;;  %2321 = vmatprep.subr.bf16.mxu0 %v3021_v63 }
  0x41   :  { %2331 = vmatprep.subr.bf16.mxu1 %v2937_v5  ;;  %1997 = vmatprep.mubr.msk.f32.mxu1 %vm2938_vm1, %v2936_v0 }
  0x43   :  { %2323 = vmatpush1.bf16.msra.mxu0 %v3027_v10 }
  0x44   :  { %2333 = vmatpush3.bf16.msra.mxu1 %v3030_v12  ;;  %2325 = vmatprep.subr.bf16.mxu0 %v3033_v13 }
  0x45   :  { %2334 = vmatprep.subr.bf16.mxu1 %v2937_v5 }
  0x47   :  { %2327 = vmatpush1.bf16.msra.mxu0 %v3039_v18 }
  0x48   :  { %2336 = vmatpush3.bf16.msra.mxu1 %v3042_v19  ;;  %2353 = vmatprep.subr.bf16.mxu0 %v2981_v4 }
  0x49   :  { %2337 = vmatprep.subr.bf16.mxu1 %v2937_v5 }
  0x4a   :  { %345 = vmatmul.mubr.f32.vlgmr.msra.gmra.mrb[0].mxu0 %v2936_v0 }
  0x4b   :  { %2355 = vmatpush1.bf16.msra.mxu0 %v2983_v8  ;;  %507 = vmatprep.mubr.f32.mxu0 %v2936_v0 }
  0x4c   :  { %2339 = vmatpush3.bf16.msra.mxu1 %v3048_v23  ;;  %2357 = vmatprep.subr.bf16.mxu0 %v2985_v9 }
  0x4d   :  { %2340 = vmatprep.subr.bf16.mxu1 %v2937_v5 }
  0x4f   :  { %2359 = vmatpush1.bf16.msra.mxu0 %v2989_v16 }
  0x50   :  { %2342 = vmatpush3.bf16.msra.mxu1 %v3054_v26  ;;  %2361 = vmatprep.subr.bf16.mxu0 %v2992_v20 }
  0x51   :  { %2343 = vmatprep.subr.bf16.mxu1 %v2937_v5 }
  0x53   :  { %2363 = vmatpush1.bf16.msra.mxu0 %v2995_v31 }
  0x54   :  { %2345 = vmatpush3.bf16.msra.mxu1 %v3061_v29  ;;  %2365 = vmatprep.subr.bf16.mxu0 %v2998_v34 }
  0x55   :  { %2346 = vmatprep.subr.bf16.mxu1 %v2937_v5 }
  0x57   :  { %2367 = vmatpush1.bf16.msra.mxu0 %v3001_v43 }
  0x58   :  { %2348 = vmatpush3.bf16.msra.mxu1 %v3067_v33  ;;  %2369 = vmatprep.subr.bf16.mxu0 %v3004_v45 }
  0x59   :  { %2349 = vmatprep.subr.bf16.mxu1 %v2937_v5 }
  0x5b   :  { %2371 = vmatpush1.bf16.msra.mxu0 %v3008_v51 }
  0x5c   :  { %2351 = vmatpush3.bf16.msra.mxu1 %v3073_v37  ;;  %2373 = vmatprep.subr.bf16.mxu0 %v3011_v54 }
  0x5d   :  { %2384 = vmatprep.subr.bf16.mxu1 %v2937_v5 }
  0x5f   :  { %1998 = vmatmul.mubr.f32.vlgmr.msra.gmra.mrb[6].mxu1 %v2936_v0  ;;  %2375 = vmatpush1.bf16.msra.mxu0 %v3016_v60 }
  0x60   :  { %2386 = vmatpush3.bf16.msra.mxu1 %v3018_v62  ;;  %2377 = vmatprep.subr.bf16.mxu0 %v3021_v63 }
  0x61   :  { %2387 = vmatprep.subr.bf16.mxu1 %v2937_v5  ;;  %2032 = vmatprep.mubr.msk.f32.mxu1 %vm2938_vm1, %v2936_v0 }
  0x63   :  { %2379 = vmatpush1.bf16.msra.mxu0 %v3027_v10 }
  0x64   :  { %2389 = vmatpush3.bf16.msra.mxu1 %v3030_v12  ;;  %2381 = vmatprep.subr.bf16.mxu0 %v3033_v13 }
  0x65   :  { %2390 = vmatprep.subr.bf16.mxu1 %v2937_v5 }
  0x67   :  { %2383 = vmatpush1.bf16.msra.mxu0 %v3039_v18 }
  0x68   :  { %2392 = vmatpush3.bf16.msra.mxu1 %v3042_v19  ;;  %2409 = vmatprep.subr.bf16.mxu0 %v2981_v4 }
  0x69   :  { %2393 = vmatprep.subr.bf16.mxu1 %v2937_v5 }
  0x6c   :  { %2395 = vmatpush3.bf16.msra.mxu1 %v3048_v23 }
  0x6d   :  { %2396 = vmatprep.subr.bf16.mxu1 %v2937_v5 }
  0x70   :  { %2398 = vmatpush3.bf16.msra.mxu1 %v3054_v26 }
  0x71   :  { %2399 = vmatprep.subr.bf16.mxu1 %v2937_v5 }
  0x74   :  { %2401 = vmatpush3.bf16.msra.mxu1 %v3061_v29 }
  0x75   :  { %2402 = vmatprep.subr.bf16.mxu1 %v2937_v5 }
  0x78   :  { %2404 = vmatpush3.bf16.msra.mxu1 %v3067_v33 }
  0x79   :  { %2405 = vmatprep.subr.bf16.mxu1 %v2937_v5 }
  0x7c   :  { %2407 = vmatpush3.bf16.msra.mxu1 %v3073_v37 }
  0x7d   :  { %2440 = vmatprep.subr.bf16.mxu1 %v2937_v5 }
 0x10a   :  { %v194_v42 = vpop.f32.mrb[0].mxu1 }
 0x10b   :  { %v196_v46 = vpop.f32.mrb[1].mxu1  ;;  %v3113_v61 = vadd.f32 %v194_v42, %v109_v48 }
 0x10c   :  { %v3116_v6 = vadd.f32 %v196_v46, %v113_v49 }
 0x10e   :  { %v200_v50 = vpop.f32.mrb[2].mxu1 }
 0x10f   :  { %v3107_v52 = vadd.f32 %v200_v50, %v109_v48  ;;  %v202_v53 = vpop.f32.mrb[3].mxu1 }
 0x110   :  { %v3109_v56 = vadd.f32 %v202_v53, %v113_v49 }
 0x112   :  { %v1964_v57 = vpop.f32.mrb[4].mxu1 }
 0x113   :  { %v3111_v58 = vadd.f32 %v1964_v57, %v117_v55  ;;  %v271_v59 = vpop.f32.mrb[5].mxu1 }
 0x114   :  { %v3122_v32 = vadd.f32 %v271_v59, %v117_v55 }
 0x11d   :  { %v346_v1 = vpop.f32.mrb[0].mxu0 }
 0x11e   :  { %v421_v2 = vadd.f32 %v346_v1, %v3113_v61  ;;  %v348_v3 = vpop.f32.mrb[1].mxu0 }
 0x11f   :  { %v428_v11 = vadd.f32 %v348_v3, %v3116_v6 }
 0x120   :  { %v1779_v7 = vmul.f32 -1.442695, %v421_v2 }
 0x121   :  { %v1780_v14 = vmul.f32 -1.442695, %v428_v11 }
 0x122   :  { %2778 = vpow2.f32 %v1779_v7 }
 0x123   :  { %2780 = vpow2.f32 %v1780_v14 }
 0x12c   :  { %v2779_v15 = vpop.eup %2778 }
 0x12d   :  { %v425_v17 = vadd.f32 1.0, %v2779_v15  ;;  %v2781_v24 = vpop.eup %2780 }
 0x12e   :  { %v432_v27 = vadd.f32 1.0, %v2781_v24 }
 0x12f   :  { %2782 = vrcp.f32 %v425_v17 }
 0x130   :  { %2784 = vrcp.f32 %v432_v27 }
 0x132   :  { %v417_v21 = vpop.f32.mrb[6].mxu1 }
 0x133   :  { %v1999_v22 = vpop.f32.mrb[7].mxu1  ;;  %v435_v28 = vadd.f32 %v417_v21, %v3119_v25 }
 0x139   :  { %v2783_v30 = vpop.eup %2782 }
 0x13a   :  { %v436_v35 = vmul.f32 %v2783_v30, %v435_v28  ;;  %v2785_v38 = vpop.eup %2784 }
 0x13b   :  { %v439_v39 = vsub.f32 1.0, %v2785_v38  ;;  %v441_v42 = vmul.f32 0.0, %v2785_v38 }
 0x13c   :  { %v437_v36 = vadd.f32 %v436_v35, %v3122_v32 }
 0x13e   :  { %2786 = vtanh.f32 %v437_v36 }
 0x148   :  { %v2787_v40 = vpop.eup %2786 }
 0x149   :  { %v440_v41 = vmul.f32 %v2787_v40, %v439_v39 }
 0x14b   :  { %v442_v44 = vadd.f32 %v441_v42, %v440_v41 }
 0x14d   :  { %508 = vmatmul.mubr.f32.vlgmr.msra.gmra.mrb[2].mxu0 %v442_v44  ;;  %2033 = vmatmul.mubr.f32.vlgmr.msra.gmra.mrb[8].mxu1 %v442_v44  ;;  %v614_v21 = vrot.slane %v442_v44, 6 }
 0x14e   :  { %2411 = vmatpush1.bf16.msra.mxu0 %v2983_v8  ;;  %2442 = vmatpush3.bf16.msra.mxu1 %v3018_v62 }
 0x14f   :  { %2413 = vmatprep.subr.bf16.mxu0 %v2985_v9  ;;  %2443 = vmatprep.subr.bf16.mxu1 %v2937_v5 }
 0x150   :  { %685 = vmatprep.mubr.f32.mxu0 %v2936_v0  ;;  %2067 = vmatprep.mubr.msk.f32.mxu1 %vm2938_vm1, %v2936_v0 }
 0x152   :  { %2415 = vmatpush1.bf16.msra.mxu0 %v2989_v16  ;;  %2445 = vmatpush3.bf16.msra.mxu1 %v3030_v12 }
 0x153   :  { %2417 = vmatprep.subr.bf16.mxu0 %v2992_v20  ;;  %2446 = vmatprep.subr.bf16.mxu1 %v2937_v5 }
 0x156   :  { %2419 = vmatpush1.bf16.msra.mxu0 %v2995_v31  ;;  %2448 = vmatpush3.bf16.msra.mxu1 %v3042_v19 }
 0x157   :  { %2421 = vmatprep.subr.bf16.mxu0 %v2998_v34  ;;  %2449 = vmatprep.subr.bf16.mxu1 %v2937_v5 }
 0x15a   :  { %2423 = vmatpush1.bf16.msra.mxu0 %v3001_v43  ;;  %2451 = vmatpush3.bf16.msra.mxu1 %v3048_v23 }
 0x15b   :  { %2425 = vmatprep.subr.bf16.mxu0 %v3004_v45  ;;  %2452 = vmatprep.subr.bf16.mxu1 %v2937_v5 }
 0x15e   :  { %2427 = vmatpush1.bf16.msra.mxu0 %v3008_v51  ;;  %2454 = vmatpush3.bf16.msra.mxu1 %v3054_v26 }
 0x15f   :  { %2429 = vmatprep.subr.bf16.mxu0 %v3011_v54  ;;  %2455 = vmatprep.subr.bf16.mxu1 %v2937_v5 }
 0x162   :  { %2431 = vmatpush1.bf16.msra.mxu0 %v3016_v60  ;;  %2457 = vmatpush3.bf16.msra.mxu1 %v3061_v29 }
 0x163   :  { %2433 = vmatprep.subr.bf16.mxu0 %v3021_v63  ;;  %2458 = vmatprep.subr.bf16.mxu1 %v2937_v5 }
 0x166   :  { %2435 = vmatpush1.bf16.msra.mxu0 %v3027_v10  ;;  %2460 = vmatpush3.bf16.msra.mxu1 %v3067_v33 }
 0x167   :  { %2437 = vmatprep.subr.bf16.mxu0 %v3033_v13  ;;  %2461 = vmatprep.subr.bf16.mxu1 %v2937_v5 }
 0x16a   :  { %2439 = vmatpush1.bf16.msra.mxu0 %v3039_v18  ;;  %2463 = vmatpush3.bf16.msra.mxu1 %v3073_v37 }
 0x16b   :  { %2465 = vmatprep.subr.bf16.mxu0 %v2981_v4  ;;  %2496 = vmatprep.subr.bf16.mxu1 %v2937_v5 }
 0x220   :  { %v509_v46 = vpop.f32.mrb[2].mxu0  ;;  %v580_v47 = vpop.f32.mrb[8].mxu1 }
 0x221   :  { %v585_v48 = vrot.slane %v509_v46, 6  ;;  %v511_v49 = vpop.f32.mrb[3].mxu0  ;;  %v2034_v50 = vpop.f32.mrb[9].mxu1  ;;  %v604_v14 = vadd.f32 %v580_v47, %v3119_v25 }
 0x222   :  { %v595_v53 = vrot.slane %v511_v49, 6 }
 0x223   :  { %v587_v55 = vadd.f32 %v585_v48, %v3113_v61  ;;  %v606_v15 = vrot.slane %v604_v14, 6 }
 0x224   :  { %v597_v57 = vadd.f32 %v595_v53, %v3116_v6 }
 0x225   :  { %v1781_v59 = vmul.f32 -1.442695, %v587_v55 }
 0x226   :  { %v1782_v1 = vmul.f32 -1.442695, %v597_v57 }
 0x227   :  { %2788 = vpow2.f32 %v1781_v59 }
 0x228   :  { %2790 = vpow2.f32 %v1782_v1 }
 0x231   :  { %v2789_v2 = vpop.eup %2788 }
 0x232   :  { %v2791_v3 = vpop.eup %2790  ;;  %v591_v7 = vadd.f32 1.0, %v2789_v2 }
 0x233   :  { %v601_v11 = vadd.f32 1.0, %v2791_v3 }
 0x234   :  { %2792 = vrcp.f32 %v591_v7 }
 0x235   :  { %2794 = vrcp.f32 %v601_v11 }
 0x23e   :  { %v2793_v17 = vpop.eup %2792 }
 0x23f   :  { %v2795_v22 = vpop.eup %2794  ;;  %v608_v24 = vmul.f32 %v2793_v17, %v606_v15 }
 0x240   :  { %v616_v27 = vmul.f32 %v2795_v22, %v614_v21  ;;  %v611_v30 = vsub.f32 1.0, %v2795_v22 }
 0x241   :  { %v609_v28 = vadd.f32 %v608_v24, %v3122_v32 }
 0x243   :  { %2796 = vtanh.f32 %v609_v28 }
 0x24d   :  { %v2797_v35 = vpop.eup %2796 }
 0x24e   :  { %v612_v36 = vmul.f32 %v2797_v35, %v611_v30 }
 0x250   :  { %v3164_v38 = vadd.f32 %v616_v27, %v612_v36 }
 0x252   :  { %v619_v39 = vrot.slane %v3164_v38, 2  ;;  %v791_v11 = vrot.slane %v3164_v38, 6 }
 0x254   :  { %686 = vmatmul.mubr.f32.vlgmr.msra.gmra.mrb[4].mxu0 %v619_v39  ;;  %2068 = vmatmul.mubr.f32.vlgmr.msra.gmra.mrb[10].mxu1 %v619_v39 }
 0x255   :  { %2467 = vmatpush1.bf16.msra.mxu0 %v2983_v8  ;;  %2498 = vmatpush3.bf16.msra.mxu1 %v3018_v62 }
 0x256   :  { %2469 = vmatprep.subr.bf16.mxu0 %v2985_v9  ;;  %2499 = vmatprep.subr.bf16.mxu1 %v2937_v5 }
 0x257   :  { %862 = vmatprep.mubr.f32.mxu0 %v2936_v0  ;;  %2102 = vmatprep.mubr.msk.f32.mxu1 %vm2938_vm1, %v2936_v0 }
 0x259   :  { %2471 = vmatpush1.bf16.msra.mxu0 %v2989_v16  ;;  %2501 = vmatpush3.bf16.msra.mxu1 %v3030_v12 }
 0x25a   :  { %2473 = vmatprep.subr.bf16.mxu0 %v2992_v20  ;;  %2502 = vmatprep.subr.bf16.mxu1 %v2937_v5 }
 0x25d   :  { %2475 = vmatpush1.bf16.msra.mxu0 %v2995_v31  ;;  %2504 = vmatpush3.bf16.msra.mxu1 %v3042_v19 }
 0x25e   :  { %2477 = vmatprep.subr.bf16.mxu0 %v2998_v34  ;;  %2505 = vmatprep.subr.bf16.mxu1 %v2937_v5 }
 0x261   :  { %2479 = vmatpush1.bf16.msra.mxu0 %v3001_v43  ;;  %2507 = vmatpush3.bf16.msra.mxu1 %v3048_v23 }
 0x262   :  { %2481 = vmatprep.subr.bf16.mxu0 %v3004_v45  ;;  %2508 = vmatprep.subr.bf16.mxu1 %v2937_v5 }
 0x265   :  { %2483 = vmatpush1.bf16.msra.mxu0 %v3008_v51  ;;  %2510 = vmatpush3.bf16.msra.mxu1 %v3054_v26 }
 0x266   :  { %2485 = vmatprep.subr.bf16.mxu0 %v3011_v54  ;;  %2511 = vmatprep.subr.bf16.mxu1 %v2937_v5 }
 0x269   :  { %2487 = vmatpush1.bf16.msra.mxu0 %v3016_v60  ;;  %2513 = vmatpush3.bf16.msra.mxu1 %v3061_v29 }
 0x26a   :  { %2489 = vmatprep.subr.bf16.mxu0 %v3021_v63  ;;  %2514 = vmatprep.subr.bf16.mxu1 %v2937_v5 }
 0x26d   :  { %2491 = vmatpush1.bf16.msra.mxu0 %v3027_v10  ;;  %2516 = vmatpush3.bf16.msra.mxu1 %v3067_v33 }
 0x26e   :  { %2493 = vmatprep.subr.bf16.mxu0 %v3033_v13  ;;  %2517 = vmatprep.subr.bf16.mxu1 %v2937_v5 }
 0x271   :  { %2495 = vmatpush1.bf16.msra.mxu0 %v3039_v18  ;;  %2519 = vmatpush3.bf16.msra.mxu1 %v3073_v37 }
 0x272   :  { %2521 = vmatprep.subr.bf16.mxu0 %v2981_v4  ;;  %2552 = vmatprep.subr.bf16.mxu1 %v2937_v5 }
 0x327   :  { %v687_v40 = vpop.f32.mrb[4].mxu0  ;;  %v758_v41 = vpop.f32.mrb[10].mxu1 }
 0x328   :  { %v763_v42 = vrot.slane %v687_v40, 4  ;;  %v689_v44 = vpop.f32.mrb[5].mxu0  ;;  %v2069_v46 = vpop.f32.mrb[11].mxu1  ;;  %v782_v2 = vadd.f32 %v758_v41, %v3119_v25 }
 0x329   :  { %v773_v47 = vrot.slane %v689_v44, 4 }
 0x32a   :  { %v765_v48 = vadd.f32 %v763_v42, %v3113_v61  ;;  %v784_v3 = vrot.slane %v782_v2, 4 }
 0x32b   :  { %v775_v49 = vadd.f32 %v773_v47, %v3116_v6 }
 0x32c   :  { %v1783_v50 = vmul.f32 -1.442695, %v765_v48 }
 0x32d   :  { %v1784_v53 = vmul.f32 -1.442695, %v775_v49 }
 0x32e   :  { %2798 = vpow2.f32 %v1783_v50 }
 0x32f   :  { %2800 = vpow2.f32 %v1784_v53 }
 0x338   :  { %v2799_v55 = vpop.eup %2798 }
 0x339   :  { %v2801_v57 = vpop.eup %2800  ;;  %v769_v59 = vadd.f32 1.0, %v2799_v55 }
 0x33a   :  { %v779_v1 = vadd.f32 1.0, %v2801_v57 }
 0x33b   :  { %2802 = vrcp.f32 %v769_v59 }
 0x33c   :  { %2804 = vrcp.f32 %v779_v1 }
 0x345   :  { %v2803_v7 = vpop.eup %2802 }
 0x346   :  { %v2805_v14 = vpop.eup %2804  ;;  %v786_v15 = vmul.f32 %v2803_v7, %v784_v3 }
 0x347   :  { %v793_v17 = vmul.f32 %v2805_v14, %v791_v11  ;;  %v789_v22 = vsub.f32 1.0, %v2805_v14 }
 0x348   :  { %v787_v21 = vadd.f32 %v786_v15, %v3122_v32 }
 0x34a   :  { %2806 = vtanh.f32 %v787_v21 }
 0x354   :  { %v2807_v24 = vpop.eup %2806 }
 0x355   :  { %v790_v27 = vmul.f32 %v2807_v24, %v789_v22 }
 0x357   :  { %v3207_v28 = vadd.f32 %v793_v17, %v790_v27 }
 0x359   :  { %v796_v30 = vrot.slane %v3207_v28, 4  ;;  %v968_v1 = vrot.slane %v3207_v28, 6 }
 0x35b   :  { %863 = vmatmul.mubr.f32.vlgmr.msra.gmra.mrb[6].mxu0 %v796_v30  ;;  %2103 = vmatmul.mubr.f32.vlgmr.msra.gmra.mrb[12].mxu1 %v796_v30 }
 0x35c   :  { %2523 = vmatpush1.bf16.msra.mxu0 %v2983_v8  ;;  %2554 = vmatpush3.bf16.msra.mxu1 %v3018_v62 }
 0x35d   :  { %2525 = vmatprep.subr.bf16.mxu0 %v2985_v9  ;;  %2555 = vmatprep.subr.bf16.mxu1 %v2937_v5 }
 0x35e   :  { %1039 = vmatprep.mubr.f32.mxu0 %v2936_v0  ;;  %2137 = vmatprep.mubr.msk.f32.mxu1 %vm2938_vm1, %v2936_v0 }
 0x360   :  { %2527 = vmatpush1.bf16.msra.mxu0 %v2989_v16  ;;  %2557 = vmatpush3.bf16.msra.mxu1 %v3030_v12 }
 0x361   :  { %2529 = vmatprep.subr.bf16.mxu0 %v2992_v20  ;;  %2558 = vmatprep.subr.bf16.mxu1 %v2937_v5 }
 0x364   :  { %2531 = vmatpush1.bf16.msra.mxu0 %v2995_v31  ;;  %2560 = vmatpush3.bf16.msra.mxu1 %v3042_v19 }
 0x365   :  { %2533 = vmatprep.subr.bf16.mxu0 %v2998_v34  ;;  %2561 = vmatprep.subr.bf16.mxu1 %v2937_v5 }
 0x368   :  { %2535 = vmatpush1.bf16.msra.mxu0 %v3001_v43  ;;  %2563 = vmatpush3.bf16.msra.mxu1 %v3048_v23 }
 0x369   :  { %2537 = vmatprep.subr.bf16.mxu0 %v3004_v45  ;;  %2564 = vmatprep.subr.bf16.mxu1 %v2937_v5 }
 0x36c   :  { %2539 = vmatpush1.bf16.msra.mxu0 %v3008_v51  ;;  %2566 = vmatpush3.bf16.msra.mxu1 %v3054_v26 }
 0x36d   :  { %2541 = vmatprep.subr.bf16.mxu0 %v3011_v54  ;;  %2567 = vmatprep.subr.bf16.mxu1 %v2937_v5 }
 0x370   :  { %2543 = vmatpush1.bf16.msra.mxu0 %v3016_v60  ;;  %2569 = vmatpush3.bf16.msra.mxu1 %v3061_v29 }
 0x371   :  { %2545 = vmatprep.subr.bf16.mxu0 %v3021_v63  ;;  %2570 = vmatprep.subr.bf16.mxu1 %v2937_v5 }
 0x374   :  { %2547 = vmatpush1.bf16.msra.mxu0 %v3027_v10  ;;  %2572 = vmatpush3.bf16.msra.mxu1 %v3067_v33 }
 0x375   :  { %2549 = vmatprep.subr.bf16.mxu0 %v3033_v13  ;;  %2573 = vmatprep.subr.bf16.mxu1 %v2937_v5 }
 0x378   :  { %2551 = vmatpush1.bf16.msra.mxu0 %v3039_v18  ;;  %2575 = vmatpush3.bf16.msra.mxu1 %v3073_v37 }
 0x379   :  { %2577 = vmatprep.subr.bf16.mxu0 %v2981_v4  ;;  %2608 = vmatprep.subr.bf16.mxu1 %v2937_v5 }
 0x42e   :  { %v864_v35 = vpop.f32.mrb[6].mxu0  ;;  %v935_v36 = vpop.f32.mrb[12].mxu1 }
 0x42f   :  { %v940_v38 = vrot.slane %v864_v35, 2  ;;  %v866_v39 = vpop.f32.mrb[7].mxu0  ;;  %v2104_v40 = vpop.f32.mrb[13].mxu1  ;;  %v959_v55 = vadd.f32 %v935_v36, %v3119_v25 }
 0x430   :  { %v950_v41 = vrot.slane %v866_v39, 2 }
 0x431   :  { %v942_v42 = vadd.f32 %v940_v38, %v3113_v61  ;;  %v961_v57 = vrot.slane %v959_v55, 2 }
 0x432   :  { %v952_v44 = vadd.f32 %v950_v41, %v3116_v6 }
 0x433   :  { %v1785_v46 = vmul.f32 -1.442695, %v942_v42 }
 0x434   :  { %v1786_v47 = vmul.f32 -1.442695, %v952_v44 }
 0x435   :  { %2808 = vpow2.f32 %v1785_v46 }
 0x436   :  { %2810 = vpow2.f32 %v1786_v47 }
 0x43f   :  { %v2809_v48 = vpop.eup %2808 }
 0x440   :  { %v2811_v49 = vpop.eup %2810  ;;  %v946_v50 = vadd.f32 1.0, %v2809_v48 }
 0x441   :  { %v956_v53 = vadd.f32 1.0, %v2811_v49 }
 0x442   :  { %2812 = vrcp.f32 %v946_v50 }
 0x443   :  { %2814 = vrcp.f32 %v956_v53 }
 0x44c   :  { %v2813_v59 = vpop.eup %2812 }
 0x44d   :  { %v2815_v2 = vpop.eup %2814  ;;  %v963_v61 = vmul.f32 %v2813_v59, %v961_v57 }
 0x44e   :  { %v970_v3 = vmul.f32 %v2815_v2, %v968_v1  ;;  %v966_v7 = vsub.f32 1.0, %v2815_v2 }
 0x44f   :  { %v964_v6 = vadd.f32 %v963_v61, %v3122_v32 }
 0x451   :  { %2816 = vtanh.f32 %v964_v6 }
 0x45b   :  { %v2817_v11 = vpop.eup %2816 }
 0x45c   :  { %v967_v14 = vmul.f32 %v2817_v11, %v966_v7 }
 0x45e   :  { %v971_v15 = vadd.f32 %v970_v3, %v967_v14 }
 0x460   :  { %v973_v17 = vrot.slane %v971_v15, 6 }
 0x462   :  { %1040 = vmatmul.mubr.f32.vlgmr.msra.gmra.mrb[8].mxu0 %v973_v17  ;;  %2138 = vmatmul.mubr.f32.vlgmr.msra.gmra.mrb[14].mxu1 %v973_v17 }
 0x463   :  { %2579 = vmatpush1.bf16.msra.mxu0 %v2983_v8  ;;  %2610 = vmatpush3.bf16.msra.mxu1 %v3018_v62 }
 0x464   :  { %2581 = vmatprep.subr.bf16.mxu0 %v2985_v9  ;;  %2611 = vmatprep.subr.bf16.mxu1 %v2937_v5 }
 0x465   :  { %1202 = vmatprep.mubr.f32.mxu0 %v2936_v0  ;;  %2172 = vmatprep.mubr.msk.f32.mxu1 %vm2938_vm1, %v2936_v0 }
 0x467   :  { %2583 = vmatpush1.bf16.msra.mxu0 %v2989_v16  ;;  %2613 = vmatpush3.bf16.msra.mxu1 %v3030_v12 }
 0x468   :  { %2585 = vmatprep.subr.bf16.mxu0 %v2992_v20  ;;  %2614 = vmatprep.subr.bf16.mxu1 %v2937_v5 }
 0x46b   :  { %2587 = vmatpush1.bf16.msra.mxu0 %v2995_v31  ;;  %2616 = vmatpush3.bf16.msra.mxu1 %v3042_v19 }
 0x46c   :  { %2589 = vmatprep.subr.bf16.mxu0 %v2998_v34  ;;  %2617 = vmatprep.subr.bf16.mxu1 %v2937_v5 }
 0x46f   :  { %2591 = vmatpush1.bf16.msra.mxu0 %v3001_v43  ;;  %2619 = vmatpush3.bf16.msra.mxu1 %v3048_v23 }
 0x470   :  { %2593 = vmatprep.subr.bf16.mxu0 %v3004_v45  ;;  %2620 = vmatprep.subr.bf16.mxu1 %v2937_v5 }
 0x473   :  { %2595 = vmatpush1.bf16.msra.mxu0 %v3008_v51  ;;  %2622 = vmatpush3.bf16.msra.mxu1 %v3054_v26 }
 0x474   :  { %2597 = vmatprep.subr.bf16.mxu0 %v3011_v54  ;;  %2623 = vmatprep.subr.bf16.mxu1 %v2937_v5 }
 0x477   :  { %2599 = vmatpush1.bf16.msra.mxu0 %v3016_v60  ;;  %2625 = vmatpush3.bf16.msra.mxu1 %v3061_v29 }
 0x478   :  { %2601 = vmatprep.subr.bf16.mxu0 %v3021_v63  ;;  %2626 = vmatprep.subr.bf16.mxu1 %v2937_v5 }
 0x47b   :  { %2603 = vmatpush1.bf16.msra.mxu0 %v3027_v10  ;;  %2628 = vmatpush3.bf16.msra.mxu1 %v3067_v33 }
 0x47c   :  { %2605 = vmatprep.subr.bf16.mxu0 %v3033_v13  ;;  %2629 = vmatprep.subr.bf16.mxu1 %v2937_v5 }
 0x47f   :  { %2607 = vmatpush1.bf16.msra.mxu0 %v3039_v18  ;;  %2631 = vmatpush3.bf16.msra.mxu1 %v3073_v37 }
 0x480   :  { %2633 = vmatprep.subr.bf16.mxu0 %v2981_v4  ;;  %2664 = vmatprep.subr.bf16.mxu1 %v2937_v5 }
 0x535   :  { %v1041_v32 = vpop.f32.mrb[8].mxu0  ;;  %v1112_v21 = vpop.f32.mrb[14].mxu1 }
 0x536   :  { %v1116_v22 = vadd.f32 %v1041_v32, %v3107_v52  ;;  %v1043_v24 = vpop.f32.mrb[9].mxu0  ;;  %v2139_v27 = vpop.f32.mrb[15].mxu1  ;;  %v1130_v41 = vadd.f32 %v1112_v21, %v3119_v25 }
 0x537   :  { %v1123_v30 = vadd.f32 %v1043_v24, %v3109_v56 }
 0x538   :  { %v1787_v28 = vmul.f32 -1.442695, %v1116_v22 }
 0x539   :  { %v1788_v35 = vmul.f32 -1.442695, %v1123_v30 }
 0x53a   :  { %2818 = vpow2.f32 %v1787_v28 }
 0x53b   :  { %2820 = vpow2.f32 %v1788_v35 }
 0x544   :  { %v2819_v36 = vpop.eup %2818 }
 0x545   :  { %v1120_v38 = vadd.f32 1.0, %v2819_v36  ;;  %v2821_v39 = vpop.eup %2820 }
 0x546   :  { %v1127_v40 = vadd.f32 1.0, %v2821_v39 }
 0x547   :  { %2822 = vrcp.f32 %v1120_v38 }
 0x548   :  { %2824 = vrcp.f32 %v1127_v40 }
 0x551   :  { %v2823_v42 = vpop.eup %2822 }
 0x552   :  { %v1131_v44 = vmul.f32 %v2823_v42, %v1130_v41  ;;  %v2825_v47 = vpop.eup %2824 }
 0x553   :  { %v1134_v48 = vsub.f32 1.0, %v2825_v47  ;;  %v1136_v53 = vmul.f32 %v2825_v47, %v973_v17 }
 0x554   :  { %v1132_v46 = vadd.f32 %v1131_v44, %v3111_v58 }
 0x556   :  { %2826 = vtanh.f32 %v1132_v46 }
 0x560   :  { %v2827_v49 = vpop.eup %2826 }
 0x561   :  { %v1135_v50 = vmul.f32 %v2827_v49, %v1134_v48  ;;  %v1667_v49 = vld [vmem:[#allocation5 + $0x210] sm:$0xff] }
 0x563   :  { %v1137_v55 = vadd.f32 %v1136_v53, %v1135_v50  ;;  %v1668_v50 = vld [vmem:[#allocation5 + $0x228] sm:$0xff] }
 0x564   :  { %v2745_v53 = vpack.c.bf16 %v1668_v50, %v1667_v49 }
 0x565   :  { %1203 = vmatmul.mubr.f32.vlgmr.msra.gmra.mrb[10].mxu0 %v1137_v55  ;;  %2173 = vmatmul.mubr.f32.vlgmr.msra.gmra.mrb[16].mxu1 %v1137_v55  ;;  %v1309_v27 = vrot.slane %v1137_v55, 6  ;;  %v1669_v55 = vld [vmem:[#allocation5 + $0x240] sm:$0xff] }
 0x566   :  { %2635 = vmatpush1.bf16.msra.mxu0 %v2983_v8  ;;  %2666 = vmatpush3.bf16.msra.mxu1 %v3018_v62 }
 0x567   :  { %2637 = vmatprep.subr.bf16.mxu0 %v2985_v9  ;;  %2667 = vmatprep.subr.bf16.mxu1 %v2937_v5 }
 0x568   :  { %1380 = vmatprep.mubr.f32.mxu0 %v2936_v0  ;;  %2207 = vmatprep.mubr.msk.f32.mxu1 %vm2938_vm1, %v2936_v0 }
 0x56a   :  { %2639 = vmatpush1.bf16.msra.mxu0 %v2989_v16  ;;  %2669 = vmatpush3.bf16.msra.mxu1 %v3030_v12 }
 0x56b   :  { %2641 = vmatprep.subr.bf16.mxu0 %v2992_v20  ;;  %2670 = vmatprep.subr.bf16.mxu1 %v2937_v5 }
 0x56e   :  { %2643 = vmatpush1.bf16.msra.mxu0 %v2995_v31  ;;  %2672 = vmatpush3.bf16.msra.mxu1 %v3042_v19 }
 0x56f   :  { %2645 = vmatprep.subr.bf16.mxu0 %v2998_v34  ;;  %2673 = vmatprep.subr.bf16.mxu1 %v2937_v5 }
 0x572   :  { %2647 = vmatpush1.bf16.msra.mxu0 %v3001_v43  ;;  %2675 = vmatpush3.bf16.msra.mxu1 %v3048_v23 }
 0x573   :  { %2649 = vmatprep.subr.bf16.mxu0 %v3004_v45  ;;  %2676 = vmatprep.subr.bf16.mxu1 %v2937_v5 }
 0x576   :  { %2651 = vmatpush1.bf16.msra.mxu0 %v3008_v51  ;;  %2678 = vmatpush3.bf16.msra.mxu1 %v3054_v26 }
 0x577   :  { %2653 = vmatprep.subr.bf16.mxu0 %v3011_v54  ;;  %2679 = vmatprep.subr.bf16.mxu1 %v2937_v5 }
 0x57a   :  { %2655 = vmatpush1.bf16.msra.mxu0 %v3016_v60  ;;  %2681 = vmatpush3.bf16.msra.mxu1 %v3061_v29 }
 0x57b   :  { %2657 = vmatprep.subr.bf16.mxu0 %v3021_v63  ;;  %2682 = vmatprep.subr.bf16.mxu1 %v2937_v5 }
 0x57e   :  { %2659 = vmatpush1.bf16.msra.mxu0 %v3027_v10  ;;  %2684 = vmatpush3.bf16.msra.mxu1 %v3067_v33 }
 0x57f   :  { %2661 = vmatprep.subr.bf16.mxu0 %v3033_v13  ;;  %2685 = vmatprep.subr.bf16.mxu1 %v2937_v5 }
 0x582   :  { %2663 = vmatpush1.bf16.msra.mxu0 %v3039_v18  ;;  %2687 = vmatpush3.bf16.msra.mxu1 %v3073_v37 }
 0x583   :  { %2689 = vmatprep.subr.bf16.mxu0 %v2981_v4  ;;  %2720 = vmatprep.subr.bf16.mxu1 %v2937_v5 }
 0x638   :  { %v1204_v57 = vpop.f32.mrb[10].mxu0  ;;  %v1275_v59 = vpop.f32.mrb[16].mxu1 }
 0x639   :  { %v1280_v1 = vrot.slane %v1204_v57, 6  ;;  %v1206_v2 = vpop.f32.mrb[11].mxu0  ;;  %v2174_v61 = vpop.f32.mrb[17].mxu1  ;;  %v1299_v21 = vadd.f32 %v1275_v59, %v3119_v25  ;;  %v1670_v57 = vld [vmem:[#allocation5 + $0x258] sm:$0xff] }
 0x63a   :  { %v1290_v3 = vrot.slane %v1206_v2, 6  ;;  %v2748_v59 = vpack.c.bf16 %v1670_v57, %v1669_v55  ;;  %v1672_v2 = vld [vmem:[#allocation5 + $0x288] sm:$0xff] }
 0x63b   :  { %v1282_v6 = vadd.f32 %v1280_v1, %v3107_v52  ;;  %v1301_v22 = vrot.slane %v1299_v21, 6  ;;  %v1671_v1 = vld [vmem:[#allocation5 + $0x270] sm:$0xff]  ;;  %v1680_v21 = vld [vmem:[#allocation5 + $0x348] sm:$0xff] }
 0x63c   :  { %v1292_v7 = vadd.f32 %v1290_v3, %v3109_v56  ;;  %v2751_v61 = vpack.c.bf16 %v1672_v2, %v1671_v1  ;;  %v1673_v3 = vld [vmem:[#allocation5 + $0x2a0] sm:$0xff] }
 0x63d   :  { %v1789_v11 = vmul.f32 -1.442695, %v1282_v6 }
 0x63e   :  { %v1790_v14 = vmul.f32 -1.442695, %v1292_v7  ;;  %v1675_v7 = vld [vmem:[#allocation5 + $0x2d0] sm:$0xff] }
 0x63f   :  { %2828 = vpow2.f32 %v1789_v11  ;;  %v1676_v11 = vld [vmem:[#allocation5 + $0x2e8] sm:$0xff] }
 0x640   :  { %2830 = vpow2.f32 %v1790_v14  ;;  %v2757_v14 = vpack.c.bf16 %v1676_v11, %v1675_v7 }
 0x649   :  { %v2829_v15 = vpop.eup %2828 }
 0x64a   :  { %v2831_v17 = vpop.eup %2830  ;;  %v1286_v32 = vadd.f32 1.0, %v2829_v15  ;;  %v1677_v15 = vld [vmem:[#allocation5 + $0x300] sm:$0xff] }
 0x64b   :  { %v1296_v4 = vadd.f32 1.0, %v2831_v17  ;;  %v1678_v17 = vld [vmem:[#allocation5 + $0x318] sm:$0xff] }
 0x64c   :  { %2832 = vrcp.f32 %v1286_v32  ;;  %v2760_v32 = vpack.c.bf16 %v1678_v17, %v1677_v15 }
 0x64d   :  { %2834 = vrcp.f32 %v1296_v4  ;;  %v1679_v4 = vld [vmem:[#allocation5 + $0x330] sm:$0xff] }
 0x656   :  { %v2833_v24 = vpop.eup %2832 }
 0x657   :  { %v2835_v28 = vpop.eup %2834  ;;  %v1303_v30 = vmul.f32 %v2833_v24, %v1301_v22  ;;  %v2763_v22 = vpack.c.bf16 %v1680_v21, %v1679_v4  ;;  %v1681_v24 = vld [vmem:[#allocation5 + $0x360] sm:$0xff] }
 0x658   :  { %v1311_v35 = vmul.f32 %v2835_v28, %v1309_v27  ;;  %v1306_v38 = vsub.f32 1.0, %v2835_v28  ;;  %v1682_v27 = vld [vmem:[#allocation5 + $0x378] sm:$0xff] }
 0x659   :  { %v1304_v36 = vadd.f32 %v1303_v30, %v3111_v58  ;;  %v2766_v28 = vpack.c.bf16 %v1682_v27, %v1681_v24 }
 0x65b   :  { %2836 = vtanh.f32 %v1304_v36 }
 0x665   :  { %v2837_v39 = vpop.eup %2836 }
 0x666   :  { %v1307_v40 = vmul.f32 %v2837_v39, %v1306_v38 }
 0x668   :  { %v1312_v41 = vadd.f32 %v1311_v35, %v1307_v40 }
 0x66a   :  { %v1314_v42 = vrot.slane %v1312_v41, 2 }
 0x66c   :  { %1381 = vmatmul.mubr.f32.vlgmr.msra.gmra.mrb[12].mxu0 %v1314_v42  ;;  %2208 = vmatmul.mubr.f32.vlgmr.msra.gmra.mrb[18].mxu1 %v1314_v42 }
 0x66d   :  { %2691 = vmatpush1.bf16.msra.mxu0 %v2983_v8  ;;  %2722 = vmatpush3.bf16.msra.mxu1 %v3018_v62 }
 0x66e   :  { %2693 = vmatprep.subr.bf16.mxu0 %v2985_v9  ;;  %2723 = vmatprep.subr.bf16.mxu1 %v2937_v5 }
 0x66f   :  { %1557 = vmatprep.mubr.f32.mxu0 %v2936_v0  ;;  %2242 = vmatprep.mubr.msk.f32.mxu1 %vm2938_vm1, %v2936_v0 }
 0x671   :  { %2695 = vmatpush1.bf16.msra.mxu0 %v2989_v16  ;;  %2725 = vmatpush3.bf16.msra.mxu1 %v3030_v12 }
 0x672   :  { %2697 = vmatprep.subr.bf16.mxu0 %v2992_v20  ;;  %2726 = vmatprep.subr.bf16.mxu1 %v2937_v5 }
 0x675   :  { %2699 = vmatpush1.bf16.msra.mxu0 %v2995_v31  ;;  %2728 = vmatpush3.bf16.msra.mxu1 %v3042_v19  ;;  %v1486_v19 = vrot.slane %v1312_v41, 6 }
 0x676   :  { %2701 = vmatprep.subr.bf16.mxu0 %v2998_v34  ;;  %2729 = vmatprep.subr.bf16.mxu1 %v2937_v5 }
 0x679   :  { %2703 = vmatpush1.bf16.msra.mxu0 %v3001_v43  ;;  %2731 = vmatpush3.bf16.msra.mxu1 %v3048_v23 }
 0x67a   :  { %2705 = vmatprep.subr.bf16.mxu0 %v3004_v45  ;;  %2732 = vmatprep.subr.bf16.mxu1 %v2937_v5 }
 0x67d   :  { %2707 = vmatpush1.bf16.msra.mxu0 %v3008_v51  ;;  %2734 = vmatpush3.bf16.msra.mxu1 %v3054_v26 }
 0x67e   :  { %2709 = vmatprep.subr.bf16.mxu0 %v3011_v54  ;;  %2735 = vmatprep.subr.bf16.mxu1 %v2937_v5 }
 0x681   :  { %2711 = vmatpush1.bf16.msra.mxu0 %v3016_v60  ;;  %2737 = vmatpush3.bf16.msra.mxu1 %v3061_v29 }
 0x682   :  { %2713 = vmatprep.subr.bf16.mxu0 %v3021_v63  ;;  %2738 = vmatprep.subr.bf16.mxu1 %v2937_v5 }
 0x685   :  { %2715 = vmatpush1.bf16.msra.mxu0 %v3027_v10  ;;  %2740 = vmatpush3.bf16.msra.mxu1 %v3067_v33 }
 0x686   :  { %2717 = vmatprep.subr.bf16.mxu0 %v3033_v13  ;;  %2741 = vmatprep.subr.bf16.mxu1 %v2937_v5 }
 0x689   :  { %2719 = vmatpush1.bf16.msra.mxu0 %v3039_v18  ;;  %2743 = vmatpush3.bf16.msra.mxu1 %v3073_v37 }
 0x68a   :  { %2744 = vmatprep.subr.bf16.mxu0 %v2937_v5 }
 0x73f   :  { %v1382_v8 = vpop.f32.mrb[12].mxu0  ;;  %v1453_v9 = vpop.f32.mrb[18].mxu1 }
 0x740   :  { %v1458_v16 = vrot.slane %v1382_v8, 4  ;;  %v1384_v20 = vpop.f32.mrb[13].mxu0  ;;  %v2209_v31 = vpop.f32.mrb[19].mxu1  ;;  %v1477_v12 = vadd.f32 %v1453_v9, %v3119_v25 }
 0x741   :  { %v1468_v34 = vrot.slane %v1384_v20, 4 }
 0x742   :  { %v1460_v43 = vadd.f32 %v1458_v16, %v3107_v52  ;;  %v1479_v13 = vrot.slane %v1477_v12, 4 }
 0x743   :  { %v1470_v45 = vadd.f32 %v1468_v34, %v3109_v56 }
 0x744   :  { %v1791_v51 = vmul.f32 -1.442695, %v1460_v43 }
 0x745   :  { %v1792_v54 = vmul.f32 -1.442695, %v1470_v45 }
 0x746   :  { %2838 = vpow2.f32 %v1791_v51 }
 0x747   :  { %2840 = vpow2.f32 %v1792_v54 }
 0x750   :  { %v2839_v60 = vpop.eup %2838 }
 0x751   :  { %v2841_v62 = vpop.eup %2840  ;;  %v1464_v63 = vadd.f32 1.0, %v2839_v60 }
 0x752   :  { %v1474_v10 = vadd.f32 1.0, %v2841_v62 }
 0x753   :  { %2842 = vrcp.f32 %v1464_v63 }
 0x754   :  { %2844 = vrcp.f32 %v1474_v10 }
 0x75d   :  { %v2843_v18 = vpop.eup %2842 }
 0x75e   :  { %v2845_v23 = vpop.eup %2844  ;;  %v1481_v26 = vmul.f32 %v2843_v18, %v1479_v13  ;;  %v1683_v18 = vld [vmem:[#allocation5 + $0x390] ss:$0 sm:$0xff] }
 0x75f   :  { %v1488_v29 = vmul.f32 %v2845_v23, %v1486_v19  ;;  %v1484_v37 = vsub.f32 1.0, %v2845_v23 }
 0x760   :  { %v1482_v33 = vadd.f32 %v1481_v26, %v3111_v58 }
 0x762   :  { %2846 = vtanh.f32 %v1482_v33 }
 0x76c   :  { %v2847_v44 = vpop.eup %2846 }
 0x76d   :  { %v1485_v46 = vmul.f32 %v2847_v44, %v1484_v37 }
 0x76f   :  { %v3366_v47 = vadd.f32 %v1488_v29, %v1485_v46 }
 0x771   :  { %v1491_v48 = vrot.slane %v3366_v47, 4  ;;  %v1663_v51 = vrot.slane %v3366_v47, 6 }
 0x773   :  { %1558 = vmatmul.mubr.f32.vlgmr.msra.gmra.mrb[14].mxu0 %v1491_v48  ;;  %2243 = vmatmul.mubr.f32.vlgmr.msra.gmra.mrb[20].mxu1 %v1491_v48 }
 0x774   :  { %2277 = vmatprep.mubr.msk.f32.mxu0 %vm2938_vm1, %v2936_v0  ;;  %2746 = vmatpush3.bf16.msra.mxu0 %v2745_v53  ;;  %v1674_v0 = vld [vmem:[#allocation5 + $0x2b8] sm:$0xff] }
 0x775   :  { %2747 = vmatprep.subr.bf16.mxu0 %v2937_v5  ;;  %v2754_v6 = vpack.c.bf16 %v1674_v0, %v1673_v3 }
 0x778   :  { %2749 = vmatpush3.bf16.msra.mxu0 %v2748_v59 }
 0x779   :  { %2750 = vmatprep.subr.bf16.mxu0 %v2937_v5 }
 0x77c   :  { %2752 = vmatpush3.bf16.msra.mxu0 %v2751_v61 }
 0x77d   :  { %2753 = vmatprep.subr.bf16.mxu0 %v2937_v5 }
 0x780   :  { %2755 = vmatpush3.bf16.msra.mxu0 %v2754_v6 }
 0x781   :  { %2756 = vmatprep.subr.bf16.mxu0 %v2937_v5 }
 0x784   :  { %2758 = vmatpush3.bf16.msra.mxu0 %v2757_v14 }
 0x785   :  { %2759 = vmatprep.subr.bf16.mxu0 %v2937_v5 }
 0x788   :  { %2761 = vmatpush3.bf16.msra.mxu0 %v2760_v32 }
 0x789   :  { %2762 = vmatprep.subr.bf16.mxu0 %v2937_v5 }
 0x78c   :  { %2764 = vmatpush3.bf16.msra.mxu0 %v2763_v22 }
 0x78d   :  { %2765 = vmatprep.subr.bf16.mxu0 %v2937_v5 }
 0x790   :  { %2767 = vmatpush3.bf16.msra.mxu0 %v2766_v28 }
 0x846   :  { %v1559_v30 = vpop.f32.mrb[14].mxu0  ;;  %v1630_v35 = vpop.f32.mrb[20].mxu1 }
 0x847   :  { %v1635_v36 = vrot.slane %v1559_v30, 2  ;;  %v1561_v38 = vpop.f32.mrb[15].mxu0  ;;  %v2244_v39 = vpop.f32.mrb[21].mxu1  ;;  %v1654_v5 = vadd.f32 %v1630_v35, %v3119_v25 }
 0x848   :  { %v1645_v40 = vrot.slane %v1561_v38, 2 }
 0x849   :  { %v1637_v41 = vadd.f32 %v1635_v36, %v3107_v52  ;;  %v1656_v43 = vrot.slane %v1654_v5, 2 }
 0x84a   :  { %v1647_v42 = vadd.f32 %v1645_v40, %v3109_v56 }
 0x84b   :  { %v1793_v8 = vmul.f32 -1.442695, %v1637_v41 }
 0x84c   :  { %v1794_v9 = vmul.f32 -1.442695, %v1647_v42 }
 0x84d   :  { %2848 = vpow2.f32 %v1793_v8 }
 0x84e   :  { %2850 = vpow2.f32 %v1794_v9 }
 0x857   :  { %v2849_v16 = vpop.eup %2848 }
 0x858   :  { %v2851_v20 = vpop.eup %2850  ;;  %v1641_v31 = vadd.f32 1.0, %v2849_v16 }
 0x859   :  { %v1651_v34 = vadd.f32 1.0, %v2851_v20 }
 0x85a   :  { %2852 = vrcp.f32 %v1641_v31 }
 0x85b   :  { %2854 = vrcp.f32 %v1651_v34 }
 0x864   :  { %v2853_v45 = vpop.eup %2852 }
 0x865   :  { %v2855_v54 = vpop.eup %2854  ;;  %v1658_v52 = vmul.f32 %v2853_v45, %v1656_v43 }
 0x866   :  { %v1665_v60 = vmul.f32 %v2855_v54, %v1663_v51  ;;  %v1661_v62 = vsub.f32 1.0, %v2855_v54 }
 0x867   :  { %v1659_v56 = vadd.f32 %v1658_v52, %v3111_v58 }
 0x869   :  { %2856 = vtanh.f32 %v1659_v56 }
 0x873   :  { %v2857_v63 = vpop.eup %2856 }
 0x874   :  { %v1662_v10 = vmul.f32 %v2857_v63, %v1661_v62 }
 0x876   :  { %v1666_v12 = vadd.f32 %v1665_v60, %v1662_v10 }
 0x878   :  { %v1685_v13 = vrot.slane %v1666_v12, 6 }
 0x87a   :  { %2278 = vmatmul.mubr.f32.vlgmr.msra.gmra.mrb[16].mxu0 %v1685_v13 }
 0x94d   :  { %v1753_v25 = vpop.f32.mrb[16].mxu0 }
 0x94e   :  { %v1754_v19 = vadd.f32 %v1753_v25, %v1683_v18  ;;  %v2279_v23 = vpop.f32.mrb[17].mxu0 }
 0x950   :  { %1758 = vst.msk [vmem:[#allocation7] sm:$0x3] %vm1757_vm2, %v1754_v19 }
 0x951   :  { %2913 = shalt.err (!%p2910_p6)
}
 0x952   :  { %s2914_s12 = scalar_lea.hbm %s3397_s2, 32 }
 0x953   :  { %p2915_p7 = scmp.ne.s32.totalorder %s3397_s2, %s2914_s12  ;;  %p2918_p8 = scmp.lt.u32.totalorder %s2914_s12, %s3397_s2 }
 0x955   :  { %p2920_p9 = pnand %p2918_p8, %p2915_p7 }
 0x957   :  { %2923 = shalt.err (!%p2920_p9)
}
 0x958   :  { %1768 = dma.vmem_to_hbm [thread:$0]  %s1766_s8, 32, %s3397_s2, [#allocation4]  }
 0x959   :  { %2928 = dma.done.wait [#allocation4], 32  }
 0x95a   :  { %2929 = vsyncadd [#allocation4], 4294967264 }
 0x95b   :  { %1772 = vsyncpa [#allocation3], 1 }
 0x95c   :  { %1773 = vsyncpa [#allocation6], 1 }
 0x95d   :  { %1774 = vsyncpa [#allocation4], 1 }

</bundles_post_ra>
